<compile_context>
chip_gen: v7x
topology: tpu7x:2x2x1
jax: 0.10.0
libtpu: 0.0.40
codegen_flags: <defaults>
</compile_context>

<pallas_src>
import jax
import jax.numpy as jnp
from jax.experimental import pallas as pl
from jax.experimental.pallas import tpu as pltpu

V_BLOCK_MAX = 2048  # max vocab tile width (lane-dense, multiple of 128)


def _vocab_tiling(vocab, v_block_max=V_BLOCK_MAX):
    """Pick a lane-dense vocab tile and padded vocab size (grid collapses for small vocabs)."""
    v128 = ((vocab + 127) // 128) * 128
    v_block = min(v_block_max, v128)
    vpad = ((v128 + v_block - 1) // v_block) * v_block
    return vpad, v_block


def _decoder_kernel(x_ref, h0_ref, enc_ref, encp_ref,
                    w_ih_ref, w_hh_ref, b_ih_ref, b_hh_ref,
                    w_attn_h_ref, b_attn_ref, v_ref,
                    w_fc_ref, b_fc_ref,
                    pred_ref, hnew_ref, a_ref,
                    hcat_sc):
    # ---- vocab block 0: GRU cell + attention (results cached in VMEM scratch) ----
    @pl.when(pl.program_id(0) == 0)
    def _():
        x = x_ref[...]                     # [B, EMB]
        h = h0_ref[...]                    # [B, DH]
        DH = h.shape[1]

        # GRU cell, PyTorch gate order (r, z, n); single layer, single time step.
        gi = jnp.dot(x, w_ih_ref[...], preferred_element_type=jnp.float32) + b_ih_ref[...]
        gh = jnp.dot(h, w_hh_ref[...], preferred_element_type=jnp.float32) + b_hh_ref[...]
        r = jax.nn.sigmoid(gi[:, :DH] + gh[:, :DH])
        z = jax.nn.sigmoid(gi[:, DH:2 * DH] + gh[:, DH:2 * DH])
        n = jnp.tanh(gi[:, 2 * DH:] + r * gh[:, 2 * DH:])
        h_new = (1.0 - z) * n + z * h      # [B, DH]  (== GRU "output" for 1 layer / 1 step)
        hnew_ref[...] = h_new

        # additive attention: energy = tanh(h_new @ W_h + (enc @ W_e)[precomputed] + b)
        enc = enc_ref[...]                 # [B, S, E2]   (values)
        encp = encp_ref[...]               # [B, S, DH]   (pre-projected keys)
        hq = (jnp.dot(h_new, w_attn_h_ref[...], preferred_element_type=jnp.float32)
              + b_attn_ref[...])           # [B, DH]
        energy = jnp.tanh(hq[:, None, :] + encp)                    # [B, S, DH]

        # scores via VPU multiply + lane reduction (avoids an N=1 MXU matmul / masked vst)
        v_row = v_ref[...].reshape(1, 1, -1)                        # [1, 1, DH]
        scores = jnp.sum(energy * v_row, axis=-1)                   # [B, S]
        scores = scores - jnp.max(scores, axis=1, keepdims=True)
        e = jnp.exp(scores)
        a = e / jnp.sum(e, axis=1, keepdims=True)                   # exact softmax (sums to 1)
        a_ref[...] = a
        attended = jnp.sum(a[:, :, None] * enc, axis=1)             # [B, E2] weighted sum

        # cat(output, attended) once, in bf16, persists across vocab blocks
        hcat_sc[...] = jnp.concatenate([h_new, attended], axis=1).astype(hcat_sc.dtype)

    # ---- every vocab block: pred = cat(h', attended) @ W_fc + b  (merged bf16 weight) ----
    pred_ref[...] = (jnp.dot(hcat_sc[...], w_fc_ref[...], preferred_element_type=jnp.float32)
                     + b_fc_ref[...])


def init_params(key, vocab, emb, eh, dh, v_block_max=V_BLOCK_MAX):
    """Deterministic synthetic parameters matching the nn.Module shapes.

    The fc_out weight is stored merged ([output | attended] rows), vocab-padded, bf16 — so the
    decode loop never re-pads or re-copies the dominant tensor in HBM.
    """
    e2 = 2 * eh
    ks = jax.random.split(key, 12)

    def w(k, shape, scale, dtype=jnp.float32):
        return (jax.random.normal(k, shape, jnp.float32) * scale).astype(dtype)

    vpad, v_block = _vocab_tiling(vocab, v_block_max)
    pad = vpad - vocab

    # fc_out Linear(dh + e2 -> vocab): cat order = [output | attended] -> rows [0:dh] | [dh:].
    w_fc_h = w(ks[9], (dh, vocab), 1.0 / jnp.sqrt(dh + e2))
    w_fc_w = w(ks[10], (e2, vocab), 1.0 / jnp.sqrt(dh + e2))
    w_fc = jnp.pad(jnp.concatenate([w_fc_h, w_fc_w], axis=0), ((0, 0), (0, pad)))
    b_fc = jnp.pad(w(ks[11], (1, vocab), 1.0 / jnp.sqrt(dh + e2)), ((0, 0), (0, pad)))

    return dict(
        vocab=vocab, v_block=v_block,
        embedding=w(ks[0], (vocab, emb), 1.0),                         # nn.Embedding(V, EMB)
        w_ih=w(ks[1], (emb, 3 * dh), 1.0 / jnp.sqrt(dh)),              # GRU weight_ih^T
        w_hh=w(ks[2], (dh, 3 * dh), 1.0 / jnp.sqrt(dh)),               # GRU weight_hh^T
        b_ih=w(ks[3], (1, 3 * dh), 1.0 / jnp.sqrt(dh)),
        b_hh=w(ks[4], (1, 3 * dh), 1.0 / jnp.sqrt(dh)),
        # attention Linear(dh + e2 -> dh), pre-split: rows [0:dh] act on the decoder state,
        # rows [dh:] on the encoder outputs (cat order = [hidden | enc]).
        w_attn_h=w(ks[5], (dh, dh), 1.0 / jnp.sqrt(dh + e2)),
        w_attn_e=w(ks[6], (e2, dh), 1.0 / jnp.sqrt(dh + e2)),
        b_attn=w(ks[7], (1, dh), 1.0 / jnp.sqrt(dh + e2)),
        v_attn=w(ks[8], (1, dh), 1.0 / jnp.sqrt(dh)),                  # attn.v (no bias), as row
        w_fc=w_fc.astype(jnp.bfloat16),                                # merged, padded, bf16
        b_fc=b_fc,                                                     # padded, f32
    )


def precompute_attention_keys(params, encoder_outputs):
    """Step-invariant encoder-side work, done ONCE per source sequence (classic Bahdanau opt).

    encoder_outputs: [S, B, 2*EH] (PyTorch time-major). Returns batch-major values
    [B, S, 2*EH] and pre-projected attention keys enc @ W_e of shape [B, S, DH].
    """
    enc_bm = jnp.transpose(encoder_outputs, (1, 0, 2))
    enc_proj = jnp.einsum("bse,ed->bsd", enc_bm, params["w_attn_e"],
                          preferred_element_type=jnp.float32)
    return enc_bm, enc_proj


def decoder_step(params, input_ids, hidden, enc_bm, enc_proj):
    """One decode step. input_ids [B] int32, hidden [B,DH]; enc_bm [B,S,2*EH] and
    enc_proj [B,S,DH] come from precompute_attention_keys (computed once per sequence)."""
    B = input_ids.shape[0]
    S, E2 = enc_bm.shape[1], enc_bm.shape[2]
    DH = hidden.shape[1]
    EMB = params["w_ih"].shape[0]
    V = params["vocab"]
    v_block = params["v_block"]
    Vpad = params["w_fc"].shape[1]
    n_vblk = Vpad // v_block

    # Embedding gather + eval-mode dropout (identity) stay in the XLA wrapper.
    # TODO(synk): in-kernel row gather (PrefetchScalarGridSpec + pl.Element) would overlap the
    #             embedding DMA with the GRU weight DMA; minor at EMB=32.
    x = jnp.take(params["embedding"], input_ids, axis=0)              # [B, EMB]

    def full(*shape):
        # Grid-invariant input: constant block index across the vocab grid.
        # (pipeline_mode=pl.Buffered(1) would drop the second buffer on these; left at the
        #  default to keep lowering conservative — they are tiny next to the w_fc tiles.)
        return pl.BlockSpec(shape, lambda j: (0,) * len(shape))

    grid_spec = pltpu.PrefetchScalarGridSpec(
        num_scalar_prefetch=0,
        grid=(n_vblk,),
        in_specs=[
            full(B, EMB),             # x (embedded token)
            full(B, DH),              # previous hidden
            full(B, S, E2),           # encoder values
            full(B, S, DH),           # pre-projected attention keys
            full(EMB, 3 * DH),        # w_ih
            full(DH, 3 * DH),         # w_hh
            full(1, 3 * DH),          # b_ih
            full(1, 3 * DH),          # b_hh
            full(DH, DH),             # w_attn_h
            full(1, DH),              # b_attn
            full(1, DH),              # v_attn
            pl.BlockSpec((DH + E2, v_block), lambda j: (0, j)),   # merged w_fc (streamed)
            pl.BlockSpec((1, v_block), lambda j: (0, j)),         # b_fc
        ],
        out_specs=(
            pl.BlockSpec((B, v_block), lambda j: (0, j)),         # prediction (lane-dense)
            full(B, DH),                                          # new hidden
            full(B, S),                                           # attention weights
        ),
        scratch_shapes=[
            pltpu.VMEM((B, DH + E2), jnp.bfloat16),               # cat(h', attended), bf16
        ],
    )

    pred, h_new, a = pl.pallas_call(
        _decoder_kernel,
        out_shape=(
            jax.ShapeDtypeStruct((B, Vpad), jnp.float32),
            jax.ShapeDtypeStruct((B, DH), jnp.float32),
            jax.ShapeDtypeStruct((B, S), jnp.float32),
        ),
        grid_spec=grid_spec,
        # GRU/attention state lives in scratch and is computed at block 0 only, so the vocab
        # axis must run sequentially on one core -> "arbitrary".
        compiler_params=pltpu.CompilerParams(
            dimension_semantics=("arbitrary",),
            vmem_limit_bytes=32 * 1024 * 1024,   # explicit budget; safe on v5e/v6e/v7x
        ),
    )(x, hidden, enc_bm, enc_proj,
      params["w_ih"], params["w_hh"], params["b_ih"], params["b_hh"],
      params["w_attn_h"], params["b_attn"], params["v_attn"],
      params["w_fc"], params["b_fc"])

    prediction = pred[:, :V][None]                                    # [1, B, V] (torch layout)
    return prediction, h_new, a


def decoder_step_ref(params, input_ids, hidden, enc_bm, enc_proj):
    """Pure-JAX f32 reference (same bf16 fc weights), for correctness validation."""
    DH = hidden.shape[1]
    V = params["vocab"]
    x = jnp.take(params["embedding"], input_ids, axis=0)
    gi = x @ params["w_ih"] + params["b_ih"]
    gh = hidden @ params["w_hh"] + params["b_hh"]
    r = jax.nn.sigmoid(gi[:, :DH] + gh[:, :DH])
    z = jax.nn.sigmoid(gi[:, DH:2 * DH] + gh[:, DH:2 * DH])
    n = jnp.tanh(gi[:, 2 * DH:] + r * gh[:, 2 * DH:])
    h_new = (1.0 - z) * n + z * hidden
    hq = h_new @ params["w_attn_h"] + params["b_attn"]
    energy = jnp.tanh(hq[:, None, :] + enc_proj)
    scores = jnp.einsum("bsd,d->bs", energy, params["v_attn"][0])
    a = jax.nn.softmax(scores, axis=1)
    attended = jnp.einsum("bs,bse->be", a, enc_bm)
    hcat = jnp.concatenate([h_new, attended], axis=1).astype(jnp.bfloat16).astype(jnp.float32)
    pred = hcat @ params["w_fc"].astype(jnp.float32)[:, :V] + params["b_fc"][:, :V]
    return pred[None], h_new, a


if __name__ == "__main__":
    # output_dim (vocab), embedding_dim, encode_hidden_dim, decode_hidden_dim
    V, EMB, EH, DH = 256, 32, 16, 32
    B, S = 8, 16                        # batch >= sublane width, source sequence length

    key = jax.random.PRNGKey(0)
    kp, ki, kh, ke = jax.random.split(key, 4)
    params = init_params(kp, V, EMB, EH, DH)

    input_ids = jax.random.randint(ki, (B,), 0, V, dtype=jnp.int32)          # token indices
    hidden = jax.random.normal(kh, (B, DH), jnp.float32)                     # decoder hidden
    encoder_outputs = jax.random.normal(ke, (S, B, 2 * EH), jnp.float32)     # [S, B, 2*EH]

    # Step-invariant encoder projection: computed once per source sequence.
    enc_bm, enc_proj = precompute_attention_keys(params, encoder_outputs)

    prediction, h_new, a = decoder_step(params, input_ids, hidden, enc_bm, enc_proj)
    jax.block_until_ready((prediction, h_new, a))

    assert prediction.shape == (1, B, V)
    assert h_new.shape == (B, DH)
    assert a.shape == (B, S)

    # Validate against a pure-JAX reference (same bf16 fc weights; generous tolerance for
    # TPU transcendental / accumulation-order differences).
    p_ref, h_ref, a_ref = decoder_step_ref(params, input_ids, hidden, enc_bm, enc_proj)
    assert jnp.allclose(h_new, h_ref, rtol=1e-2, atol=1e-2)
    assert jnp.allclose(a, a_ref, rtol=1e-2, atol=1e-2)
    assert jnp.allclose(prediction, p_ref, rtol=2e-2, atol=2e-2)
    assert jnp.allclose(jnp.sum(a, axis=1), jnp.ones((B,)), rtol=1e-3, atol=1e-3)

    print("KERNEL_OK")
</pallas_src>

<mosaic_0001>
module attributes {stable_mosaic.version = 11 : i64} {
  func.func @_decoder_kernel(%arg0: i32, %arg1: memref<8x32xf32, #tpu.memory_space<vmem>>, %arg2: memref<8x32xf32, #tpu.memory_space<vmem>>, %arg3: memref<8x16x32xf32, #tpu.memory_space<vmem>>, %arg4: memref<8x16x32xf32, #tpu.memory_space<vmem>>, %arg5: memref<32x96xf32, #tpu.memory_space<vmem>>, %arg6: memref<32x96xf32, #tpu.memory_space<vmem>>, %arg7: memref<1x96xf32, #tpu.memory_space<vmem>>, %arg8: memref<1x96xf32, #tpu.memory_space<vmem>>, %arg9: memref<32x32xf32, #tpu.memory_space<vmem>>, %arg10: memref<1x32xf32, #tpu.memory_space<vmem>>, %arg11: memref<1x32xf32, #tpu.memory_space<vmem>>, %arg12: memref<64x256xbf16, #tpu.memory_space<vmem>>, %arg13: memref<1x256xf32, #tpu.memory_space<vmem>>, %arg14: memref<8x256xf32, #tpu.memory_space<vmem>>, %arg15: memref<8x32xf32, #tpu.memory_space<vmem>>, %arg16: memref<8x16xf32, #tpu.memory_space<vmem>>, %arg17: memref<8x64xbf16, #tpu.memory_space<vmem>>) attributes {dimension_semantics = [#tpu.dimension_semantics<arbitrary>], iteration_bounds = array<i64: 1>, scalar_prefetch = 0 : i64, scratch_operands = 1 : i64, tpu.core_type = #tpu.core_type<tc>, window_params = [{pipeline_mode = #tpu.pipeline_mode<synchronous>, transform_indices = @transform_0, window_bounds = array<i64: 8, 32>}, {pipeline_mode = #tpu.pipeline_mode<synchronous>, transform_indices = @transform_1, window_bounds = array<i64: 8, 32>}, {pipeline_mode = #tpu.pipeline_mode<synchronous>, transform_indices = @transform_2, window_bounds = array<i64: 8, 16, 32>}, {pipeline_mode = #tpu.pipeline_mode<synchronous>, transform_indices = @transform_3, window_bounds = array<i64: 8, 16, 32>}, {pipeline_mode = #tpu.pipeline_mode<synchronous>, transform_indices = @transform_4, window_bounds = array<i64: 32, 96>}, {pipeline_mode = #tpu.pipeline_mode<synchronous>, transform_indices = @transform_5, window_bounds = array<i64: 32, 96>}, {pipeline_mode = #tpu.pipeline_mode<synchronous>, transform_indices = @transform_6, window_bounds = array<i64: 1, 96>}, {pipeline_mode = #tpu.pipeline_mode<synchronous>, transform_indices = @transform_7, window_bounds = array<i64: 1, 96>}, {pipeline_mode = #tpu.pipeline_mode<synchronous>, transform_indices = @transform_8, window_bounds = array<i64: 32, 32>}, {pipeline_mode = #tpu.pipeline_mode<synchronous>, transform_indices = @transform_9, window_bounds = array<i64: 1, 32>}, {pipeline_mode = #tpu.pipeline_mode<synchronous>, transform_indices = @transform_10, window_bounds = array<i64: 1, 32>}, {transform_indices = @transform_11, window_bounds = array<i64: 64, 256>}, {transform_indices = @transform_12, window_bounds = array<i64: 1, 256>}, {transform_indices = @transform_13, window_bounds = array<i64: 8, 256>}, {pipeline_mode = #tpu.pipeline_mode<synchronous>, transform_indices = @transform_14, window_bounds = array<i64: 8, 32>}, {pipeline_mode = #tpu.pipeline_mode<synchronous>, transform_indices = @transform_15, window_bounds = array<i64: 8, 16>}]} {
    %c0_i32 = arith.constant 0 : i32
    %0 = arith.cmpi eq, %arg0, %c0_i32 : i32
    %1 = arith.extui %0 : i1 to i32
    %c0_i32_0 = arith.constant 0 : i32
    %2 = arith.cmpi ne, %1, %c0_i32_0 : i32
    scf.if %2 {
      %c0_8 = arith.constant 0 : index
      %c0_9 = arith.constant 0 : index
      %10 = vector.load %arg1[%c0_8, %c0_9] : memref<8x32xf32, #tpu.memory_space<vmem>>, vector<8x32xf32>
      %c0_10 = arith.constant 0 : index
      %c0_11 = arith.constant 0 : index
      %11 = vector.load %arg2[%c0_10, %c0_11] : memref<8x32xf32, #tpu.memory_space<vmem>>, vector<8x32xf32>
      %c0_12 = arith.constant 0 : index
      %c0_13 = arith.constant 0 : index
      %12 = vector.load %arg5[%c0_12, %c0_13] : memref<32x96xf32, #tpu.memory_space<vmem>>, vector<32x96xf32>
      %cst_14 = arith.constant dense<0.000000e+00> : vector<8x96xf32>
      %13 = tpu.matmul %10, %12, %cst_14 {dimension_numbers = #tpu.dot_dimension_numbers<[1], [0], [0], [1], [0, 0, 1, 1], [], []>} : vector<8x32xf32>, vector<32x96xf32>, vector<8x96xf32> -> vector<8x96xf32>
      %c0_15 = arith.constant 0 : index
      %c0_16 = arith.constant 0 : index
      %14 = vector.load %arg7[%c0_15, %c0_16] : memref<1x96xf32, #tpu.memory_space<vmem>>, vector<1x96xf32>
      %15 = vector.broadcast %14 : vector<1x96xf32> to vector<8x96xf32>
      %16 = arith.addf %13, %15 : vector<8x96xf32>
      %c0_17 = arith.constant 0 : index
      %c0_18 = arith.constant 0 : index
      %17 = vector.load %arg6[%c0_17, %c0_18] : memref<32x96xf32, #tpu.memory_space<vmem>>, vector<32x96xf32>
      %cst_19 = arith.constant dense<0.000000e+00> : vector<8x96xf32>
      %18 = tpu.matmul %11, %17, %cst_19 {dimension_numbers = #tpu.dot_dimension_numbers<[1], [0], [0], [1], [0, 0, 1, 1], [], []>} : vector<8x32xf32>, vector<32x96xf32>, vector<8x96xf32> -> vector<8x96xf32>
      %c0_20 = arith.constant 0 : index
      %c0_21 = arith.constant 0 : index
      %19 = vector.load %arg8[%c0_20, %c0_21] : memref<1x96xf32, #tpu.memory_space<vmem>>, vector<1x96xf32>
      %20 = vector.broadcast %19 : vector<1x96xf32> to vector<8x96xf32>
      %21 = arith.addf %18, %20 : vector<8x96xf32>
      %22 = vector.extract_strided_slice %16 {offsets = [0, 0], sizes = [8, 32], strides = [1, 1]} : vector<8x96xf32> to vector<8x32xf32>
      %23 = vector.extract_strided_slice %21 {offsets = [0, 0], sizes = [8, 32], strides = [1, 1]} : vector<8x96xf32> to vector<8x32xf32>
      %24 = arith.addf %22, %23 : vector<8x32xf32>
      %25 = arith.negf %24 : vector<8x32xf32>
      %26 = math.exp %25 : vector<8x32xf32>
      %cst_22 = arith.constant 1.000000e+00 : f32
      %27 = vector.broadcast %cst_22 : f32 to vector<8x32xf32>
      %28 = arith.addf %27, %26 : vector<8x32xf32>
      %29 = arith.divf %27, %28 : vector<8x32xf32>
      %30 = vector.extract_strided_slice %16 {offsets = [0, 32], sizes = [8, 32], strides = [1, 1]} : vector<8x96xf32> to vector<8x32xf32>
      %31 = vector.extract_strided_slice %21 {offsets = [0, 32], sizes = [8, 32], strides = [1, 1]} : vector<8x96xf32> to vector<8x32xf32>
      %32 = arith.addf %30, %31 : vector<8x32xf32>
      %33 = arith.negf %32 : vector<8x32xf32>
      %34 = math.exp %33 : vector<8x32xf32>
      %cst_23 = arith.constant 1.000000e+00 : f32
      %35 = vector.broadcast %cst_23 : f32 to vector<8x32xf32>
      %36 = arith.addf %35, %34 : vector<8x32xf32>
      %37 = arith.divf %35, %36 : vector<8x32xf32>
      %38 = vector.extract_strided_slice %16 {offsets = [0, 64], sizes = [8, 32], strides = [1, 1]} : vector<8x96xf32> to vector<8x32xf32>
      %39 = vector.extract_strided_slice %21 {offsets = [0, 64], sizes = [8, 32], strides = [1, 1]} : vector<8x96xf32> to vector<8x32xf32>
      %40 = arith.mulf %29, %39 : vector<8x32xf32>
      %41 = arith.addf %38, %40 : vector<8x32xf32>
      %42 = math.tanh %41 : vector<8x32xf32>
      %cst_24 = arith.constant 1.000000e+00 : f32
      %43 = vector.broadcast %cst_24 : f32 to vector<8x32xf32>
      %44 = arith.subf %43, %37 : vector<8x32xf32>
      %45 = arith.mulf %44, %42 : vector<8x32xf32>
      %46 = arith.mulf %37, %11 : vector<8x32xf32>
      %47 = arith.addf %45, %46 : vector<8x32xf32>
      %c0_25 = arith.constant 0 : index
      %c0_26 = arith.constant 0 : index
      %48 = vector.load %arg15[%c0_25, %c0_26] : memref<8x32xf32, #tpu.memory_space<vmem>>, vector<8x32xf32>
      tpu.vector_store %arg15[%c0_25, %c0_26], %47 {strides = array<i32>} : memref<8x32xf32, #tpu.memory_space<vmem>>, vector<8x32xf32>,
      %c0_27 = arith.constant 0 : index
      %c0_28 = arith.constant 0 : index
      %c0_29 = arith.constant 0 : index
      %49 = vector.load %arg3[%c0_27, %c0_28, %c0_29] : memref<8x16x32xf32, #tpu.memory_space<vmem>>, vector<8x16x32xf32>
      %c0_30 = arith.constant 0 : index
      %c0_31 = arith.constant 0 : index
      %c0_32 = arith.constant 0 : index
      %50 = vector.load %arg4[%c0_30, %c0_31, %c0_32] : memref<8x16x32xf32, #tpu.memory_space<vmem>>, vector<8x16x32xf32>
      %c0_33 = arith.constant 0 : index
      %c0_34 = arith.constant 0 : index
      %51 = vector.load %arg9[%c0_33, %c0_34] : memref<32x32xf32, #tpu.memory_space<vmem>>, vector<32x32xf32>
      %cst_35 = arith.constant dense<0.000000e+00> : vector<8x32xf32>
      %52 = tpu.matmul %47, %51, %cst_35 {dimension_numbers = #tpu.dot_dimension_numbers<[1], [0], [0], [1], [0, 0, 1, 1], [], []>} : vector<8x32xf32>, vector<32x32xf32>, vector<8x32xf32> -> vector<8x32xf32>
      %c0_36 = arith.constant 0 : index
      %c0_37 = arith.constant 0 : index
      %53 = vector.load %arg10[%c0_36, %c0_37] : memref<1x32xf32, #tpu.memory_space<vmem>>, vector<1x32xf32>
      %54 = vector.broadcast %53 : vector<1x32xf32> to vector<8x32xf32>
      %55 = arith.addf %52, %54 : vector<8x32xf32>
      %56 = vector.shape_cast %55 : vector<8x32xf32> to vector<8x1x32xf32>
      %57 = vector.broadcast %56 : vector<8x1x32xf32> to vector<8x16x32xf32>
      %58 = arith.addf %57, %50 : vector<8x16x32xf32>
      %59 = math.tanh %58 : vector<8x16x32xf32>
      %c0_38 = arith.constant 0 : index
      %c0_39 = arith.constant 0 : index
      %60 = vector.load %arg11[%c0_38, %c0_39] : memref<1x32xf32, #tpu.memory_space<vmem>>, vector<1x32xf32>
      %61 = vector.shape_cast %60 : vector<1x32xf32> to vector<1x1x32xf32>
      %62 = vector.broadcast %61 : vector<1x1x32xf32> to vector<8x16x32xf32>
      %63 = arith.mulf %59, %62 : vector<8x16x32xf32>
      %cst_40 = arith.constant dense<0.000000e+00> : vector<8x16xf32>
      %64 = vector.multi_reduction <add>, %63, %cst_40 [2] : vector<8x16x32xf32> to vector<8x16xf32>
      %cst_41 = arith.constant dense<0xFF800000> : vector<8xf32>
      %65 = vector.multi_reduction <maximumf>, %64, %cst_41 [1] : vector<8x16xf32> to vector<8xf32>
      %66 = vector.shape_cast %65 : vector<8xf32> to vector<8x1xf32>
      %67 = vector.broadcast %66 : vector<8x1xf32> to vector<8x16xf32>
      %68 = arith.subf %64, %67 : vector<8x16xf32>
      %69 = math.exp %68 : vector<8x16xf32>
      %cst_42 = arith.constant dense<0.000000e+00> : vector<8xf32>
      %70 = vector.multi_reduction <add>, %69, %cst_42 [1] : vector<8x16xf32> to vector<8xf32>
      %71 = vector.shape_cast %70 : vector<8xf32> to vector<8x1xf32>
      %72 = vector.broadcast %71 : vector<8x1xf32> to vector<8x16xf32>
      %73 = arith.divf %69, %72 : vector<8x16xf32>
      %c0_43 = arith.constant 0 : index
      %c0_44 = arith.constant 0 : index
      %74 = vector.load %arg16[%c0_43, %c0_44] : memref<8x16xf32, #tpu.memory_space<vmem>>, vector<8x16xf32>
      tpu.vector_store %arg16[%c0_43, %c0_44], %73 {strides = array<i32>} : memref<8x16xf32, #tpu.memory_space<vmem>>, vector<8x16xf32>,
      %75 = vector.shape_cast %73 : vector<8x16xf32> to vector<8x16x1xf32>
      %76 = vector.broadcast %75 : vector<8x16x1xf32> to vector<8x16x32xf32>
      %77 = arith.mulf %76, %49 : vector<8x16x32xf32>
      %cst_45 = arith.constant dense<0.000000e+00> : vector<8x32xf32>
      %78 = vector.multi_reduction <add>, %77, %cst_45 [1] : vector<8x16x32xf32> to vector<8x32xf32>
      %79 = tpu.concatenate %47, %78 in 1 : vector<8x32xf32>, vector<8x32xf32> -> vector<8x64xf32>
      %80 = arith.truncf %79 : vector<8x64xf32> to vector<8x64xbf16>
      %c0_46 = arith.constant 0 : index
      %c0_47 = arith.constant 0 : index
      %81 = vector.load %arg17[%c0_46, %c0_47] : memref<8x64xbf16, #tpu.memory_space<vmem>>, vector<8x64xbf16>
      tpu.vector_store %arg17[%c0_46, %c0_47], %80 {strides = array<i32>} : memref<8x64xbf16, #tpu.memory_space<vmem>>, vector<8x64xbf16>,
    } else {
    }
    %c0 = arith.constant 0 : index
    %c0_1 = arith.constant 0 : index
    %3 = vector.load %arg17[%c0, %c0_1] : memref<8x64xbf16, #tpu.memory_space<vmem>>, vector<8x64xbf16>
    %c0_2 = arith.constant 0 : index
    %c0_3 = arith.constant 0 : index
    %4 = vector.load %arg12[%c0_2, %c0_3] : memref<64x256xbf16, #tpu.memory_space<vmem>>, vector<64x256xbf16>
    %cst = arith.constant dense<0.000000e+00> : vector<8x256xf32>
    %5 = tpu.matmul %3, %4, %cst {dimension_numbers = #tpu.dot_dimension_numbers<[1], [0], [0], [1], [0, 0, 1, 1], [], []>} : vector<8x64xbf16>, vector<64x256xbf16>, vector<8x256xf32> -> vector<8x256xf32>
    %c0_4 = arith.constant 0 : index
    %c0_5 = arith.constant 0 : index
    %6 = vector.load %arg13[%c0_4, %c0_5] : memref<1x256xf32, #tpu.memory_space<vmem>>, vector<1x256xf32>
    %7 = vector.broadcast %6 : vector<1x256xf32> to vector<8x256xf32>
    %8 = arith.addf %5, %7 : vector<8x256xf32>
    %c0_6 = arith.constant 0 : index
    %c0_7 = arith.constant 0 : index
    %9 = vector.load %arg14[%c0_6, %c0_7] : memref<8x256xf32, #tpu.memory_space<vmem>>, vector<8x256xf32>
    tpu.vector_store %arg14[%c0_6, %c0_7], %8 {strides = array<i32>} : memref<8x256xf32, #tpu.memory_space<vmem>>, vector<8x256xf32>,
    return
  }
  func.func @transform_0(%arg0: i32) -> (i32, i32) {
    %c0_i32 = arith.constant 0 : i32
    %c0_i32_0 = arith.constant 0 : i32
    %c0_i32_1 = arith.constant 0 : i32
    return %c0_i32, %c0_i32_0 : i32, i32
  }
  func.func @transform_1(%arg0: i32) -> (i32, i32) {
    %c0_i32 = arith.constant 0 : i32
    %c0_i32_0 = arith.constant 0 : i32
    %c0_i32_1 = arith.constant 0 : i32
    return %c0_i32, %c0_i32_0 : i32, i32
  }
  func.func @transform_2(%arg0: i32) -> (i32, i32, i32) {
    %c0_i32 = arith.constant 0 : i32
    %c0_i32_0 = arith.constant 0 : i32
    %c0_i32_1 = arith.constant 0 : i32
    %c0_i32_2 = arith.constant 0 : i32
    return %c0_i32, %c0_i32_0, %c0_i32_1 : i32, i32, i32
  }
  func.func @transform_3(%arg0: i32) -> (i32, i32, i32) {
    %c0_i32 = arith.constant 0 : i32
    %c0_i32_0 = arith.constant 0 : i32
    %c0_i32_1 = arith.constant 0 : i32
    %c0_i32_2 = arith.constant 0 : i32
    return %c0_i32, %c0_i32_0, %c0_i32_1 : i32, i32, i32
  }
  func.func @transform_4(%arg0: i32) -> (i32, i32) {
    %c0_i32 = arith.constant 0 : i32
    %c0_i32_0 = arith.constant 0 : i32
    %c0_i32_1 = arith.constant 0 : i32
    return %c0_i32, %c0_i32_0 : i32, i32
  }
  func.func @transform_5(%arg0: i32) -> (i32, i32) {
    %c0_i32 = arith.constant 0 : i32
    %c0_i32_0 = arith.constant 0 : i32
    %c0_i32_1 = arith.constant 0 : i32
    return %c0_i32, %c0_i32_0 : i32, i32
  }
  func.func @transform_6(%arg0: i32) -> (i32, i32) {
    %c0_i32 = arith.constant 0 : i32
    %c0_i32_0 = arith.constant 0 : i32
    %c0_i32_1 = arith.constant 0 : i32
    return %c0_i32, %c0_i32_0 : i32, i32
  }
  func.func @transform_7(%arg0: i32) -> (i32, i32) {
    %c0_i32 = arith.constant 0 : i32
    %c0_i32_0 = arith.constant 0 : i32
    %c0_i32_1 = arith.constant 0 : i32
    return %c0_i32, %c0_i32_0 : i32, i32
  }
  func.func @transform_8(%arg0: i32) -> (i32, i32) {
    %c0_i32 = arith.constant 0 : i32
    %c0_i32_0 = arith.constant 0 : i32
    %c0_i32_1 = arith.constant 0 : i32
    return %c0_i32, %c0_i32_0 : i32, i32
  }
  func.func @transform_9(%arg0: i32) -> (i32, i32) {
    %c0_i32 = arith.constant 0 : i32
    %c0_i32_0 = arith.constant 0 : i32
    %c0_i32_1 = arith.constant 0 : i32
    return %c0_i32, %c0_i32_0 : i32, i32
  }
  func.func @transform_10(%arg0: i32) -> (i32, i32) {
    %c0_i32 = arith.constant 0 : i32
    %c0_i32_0 = arith.constant 0 : i32
    %c0_i32_1 = arith.constant 0 : i32
    return %c0_i32, %c0_i32_0 : i32, i32
  }
  func.func @transform_11(%arg0: i32) -> (i32, i32) {
    %c0_i32 = arith.constant 0 : i32
    %c0_i32_0 = arith.constant 0 : i32
    return %c0_i32, %arg0 : i32, i32
  }
  func.func @transform_12(%arg0: i32) -> (i32, i32) {
    %c0_i32 = arith.constant 0 : i32
    %c0_i32_0 = arith.constant 0 : i32
    return %c0_i32, %arg0 : i32, i32
  }
  func.func @transform_13(%arg0: i32) -> (i32, i32) {
    %c0_i32 = arith.constant 0 : i32
    %c0_i32_0 = arith.constant 0 : i32
    return %c0_i32, %arg0 : i32, i32
  }
  func.func @transform_14(%arg0: i32) -> (i32, i32) {
    %c0_i32 = arith.constant 0 : i32
    %c0_i32_0 = arith.constant 0 : i32
    %c0_i32_1 = arith.constant 0 : i32
    return %c0_i32, %c0_i32_0 : i32, i32
  }
  func.func @transform_15(%arg0: i32) -> (i32, i32) {
    %c0_i32 = arith.constant 0 : i32
    %c0_i32_0 = arith.constant 0 : i32
    %c0_i32_1 = arith.constant 0 : i32
    return %c0_i32, %c0_i32_0 : i32, i32
  }
}

</mosaic_0001>

<bundles_post_ra>
// kernel: tpu_custom_call.1
= control target key start
LH: loop header
LB: loop body
LE: loop exit
PB: predicated region body
PF: predicated region fallthrough
CT: control target
= control target key end

     0   :  { %21 = vsyncpa [#allocation4], 0  ;;  %s2642_s0 = inlined_call_operand.hbm [shape: f32[8,32], index: 0, kind: input, shape index: {}]   ;;  %s2643_s1 = inlined_call_operand.hbm [shape: f32[8,32], index: 1, kind: input, shape index: {}]   ;;  %s2644_s2 = inlined_call_operand.hbm [shape: f32[8,16,32], index: 2, kind: input, shape index: {}]   ;;  %s2645_s3 = inlined_call_operand.hbm [shape: f32[8,16,32], index: 3, kind: input, shape index: {}]   ;;  %s2646_s4 = inlined_call_operand.hbm [shape: f32[32,96], index: 4, kind: input, shape index: {}]   ;;  %s2647_s5 = inlined_call_operand.hbm [shape: f32[32,96], index: 5, kind: input, shape index: {}]   ;;  %s2648_s6 = inlined_call_operand.vmem [shape: f32[1,96], index: 6, kind: input, shape index: {}]   ;;  %s2649_s7 = inlined_call_operand.vmem [shape: f32[1,96], index: 7, kind: input, shape index: {}]   ;;  %s2650_s8 = inlined_call_operand.hbm [shape: f32[32,32], index: 8, kind: input, shape index: {}]   ;;  %s2651_s9 = inlined_call_operand.vmem [shape: f32[1,32], index: 9, kind: input, shape index: {}]   ;;  %s2652_s10 = inlined_call_operand.vmem [shape: f32[1,32], index: 10, kind: input, shape index: {}]   ;;  %s2653_s11 = inlined_call_operand.hbm [shape: bf16[64,256], index: 11, kind: input, shape index: {}]   ;;  %s2654_s12 = inlined_call_operand.vmem [shape: f32[1,256], index: 12, kind: input, shape index: {}]   ;;  %s2655_s13 = inlined_call_operand.hbm [shape: f32[8,256], index: 13, kind: output, shape index: {0}]   ;;  %s2656_s14 = inlined_call_operand.hbm [shape: f32[8,32], index: 14, kind: output, shape index: {1}]   ;;  %s2657_s15 = inlined_call_operand.hbm [shape: f32[8,16], index: 15, kind: output, shape index: {2}]  }
   0x1   :  { %22 = vsyncpa [#allocation7], 0 }
   0x2   :  { %23 = vsyncpa [#allocation10], 0 }
   0x3   :  { %24 = vsyncpa [#allocation13], 0 }
   0x4   :  { %25 = vsyncpa [#allocation16], 0 }
   0x5   :  { %26 = vsyncpa [#allocation5], 0 }
   0x6   :  { %27 = vsyncpa [#allocation19], 0  ;;  %s1968_s18 = smov [#allocation6]   ;;  %s1712_s22 = scalar_lea.hbm %s2643_s1, 128 }
   0x7   :  { %s44_s19 = sshll.u32 %s1968_s18, 4  ;;  %p1713_p0 = scmp.ne.s32.totalorder %s2643_s1, %s1712_s22  ;;  %s45_s19 = int_to_ptr.vmem [resolvable:$true] %s44_s19 }
   0x8   :  { %p1716_p1 = scmp.lt.u32.totalorder %s1712_s22, %s2643_s1 }
   0xa   :  { %p1718_p2 = pnand %p1716_p1, %p1713_p0 }
   0xc   :  { %1721 = shalt.err (!%p1718_p2)
}
   0xd   :  { %s1722_s27 = scalar_lea.vmem %s45_s19, 128  ;;  %p1727_p4 = scmp.lt.s32.totalorder %s45_s19, %s45_s19 }
   0xe   :  { %p1723_p3 = scmp.ne.s32.totalorder %s45_s19, %s1722_s27  ;;  %p1728_p5 = scmp.lt.s32.totalorder %s1722_s27, %s1722_s27 }
  0x10   :  { %p1729_p6 = por %p1728_p5, %p1727_p4 }
  0x12   :  { %p1730_p7 = pnand %p1729_p6, %p1723_p3 }
  0x14   :  { %1733 = shalt.err (!%p1730_p7)
}
  0x15   :  { %47 = dma.hbm_to_vmem [thread:$0]  %s2643_s1, 128, %s45_s19, [#allocation7]  }
  0x16   :  { %s1969_s30 = smov [#allocation9]   ;;  %s1970_s17 = smov [#allocation12]  }
  0x17   :  { %s65_s16 = sshll.u32 %s1969_s30, 4  ;;  %s89_s18 = sshll.u32 %s1970_s17, 4  ;;  %s66_s16 = int_to_ptr.vmem [resolvable:$true] %s65_s16  ;;  %s90_s18 = int_to_ptr.vmem [resolvable:$true] %s89_s18 }
  0x18   :  { %s1734_s22 = scalar_lea.hbm %s2645_s3, 2048 }
  0x19   :  { %p1735_p8 = scmp.ne.s32.totalorder %s2645_s3, %s1734_s22  ;;  %p1738_p9 = scmp.lt.u32.totalorder %s1734_s22, %s2645_s3 }
  0x1b   :  { %p1740_p10 = pnand %p1738_p9, %p1735_p8 }
  0x1d   :  { %1743 = shalt.err (!%p1740_p10)
}
  0x1e   :  { %s1744_s1 = scalar_lea.vmem %s66_s16, 2048  ;;  %p1749_p12 = scmp.lt.s32.totalorder %s66_s16, %s66_s16 }
  0x1f   :  { %p1745_p11 = scmp.ne.s32.totalorder %s66_s16, %s1744_s1  ;;  %p1750_p13 = scmp.lt.s32.totalorder %s1744_s1, %s1744_s1 }
  0x21   :  { %p1751_p0 = por %p1750_p13, %p1749_p12 }
  0x23   :  { %p1752_p1 = pnand %p1751_p0, %p1745_p11 }
  0x25   :  { %1755 = shalt.err (!%p1752_p1)
}
  0x26   :  { %s1971_s19 = smov 128   ;;  %s1972_s27 = smov 8  }
  0x27   :  { %71 = dma.hbm_to_vmem [thread:$0]  %s2645_s3, 2048, %s66_s16, [#allocation10], %s1971_s19, %s1971_s19, %s1972_s27  }
  0x28   :  { %s1756_s20 = scalar_lea.hbm %s2647_s5, 512 }
  0x29   :  { %p1757_p2 = scmp.ne.s32.totalorder %s2647_s5, %s1756_s20  ;;  %p1760_p3 = scmp.lt.u32.totalorder %s1756_s20, %s2647_s5 }
  0x2b   :  { %p1762_p4 = pnand %p1760_p3, %p1757_p2 }
  0x2d   :  { %1765 = shalt.err (!%p1762_p4)
}
  0x2e   :  { %s1766_s25 = scalar_lea.vmem %s90_s18, 512  ;;  %p1771_p6 = scmp.lt.s32.totalorder %s90_s18, %s90_s18 }
  0x2f   :  { %p1767_p5 = scmp.ne.s32.totalorder %s90_s18, %s1766_s25  ;;  %p1772_p7 = scmp.lt.s32.totalorder %s1766_s25, %s1766_s25 }
  0x31   :  { %p1773_p8 = por %p1772_p7, %p1771_p6 }
  0x33   :  { %p1774_p9 = pnand %p1773_p8, %p1767_p5 }
  0x35   :  { %1777 = shalt.err (!%p1774_p9)
}
  0x36   :  { %95 = dma.hbm_to_vmem [thread:$0]  %s2647_s5, 512, %s90_s18, [#allocation13], %s1971_s19, %s1971_s19, %s1972_s27  }
  0x37   :  { %s1973_s26 = smov [#allocation3]   ;;  %s1974_s28 = smov [#allocation8]  }
  0x38   :  { %s34_s1 = sshll.u32 %s1973_s26, 4  ;;  %s53_s29 = sshll.u32 %s1974_s28, 4  ;;  %s35_s1 = int_to_ptr.vmem [resolvable:$true] %s34_s1  ;;  %s54_s29 = int_to_ptr.vmem [resolvable:$true] %s53_s29 }
  0x39   :  { %s1778_s20 = scalar_lea.hbm %s2642_s0, 128 }
  0x3a   :  { %p1779_p10 = scmp.ne.s32.totalorder %s2642_s0, %s1778_s20  ;;  %p1782_p11 = scmp.lt.u32.totalorder %s1778_s20, %s2642_s0 }
  0x3c   :  { %p1784_p12 = pnand %p1782_p11, %p1779_p10 }
  0x3e   :  { %1787 = shalt.err (!%p1784_p12)
}
  0x3f   :  { %s1788_s5 = scalar_lea.vmem %s35_s1, 128  ;;  %p1793_p0 = scmp.lt.s32.totalorder %s35_s1, %s35_s1 }
  0x40   :  { %p1789_p13 = scmp.ne.s32.totalorder %s35_s1, %s1788_s5  ;;  %p1794_p1 = scmp.lt.s32.totalorder %s1788_s5, %s1788_s5 }
  0x42   :  { %p1795_p2 = por %p1794_p1, %p1793_p0 }
  0x44   :  { %p1796_p3 = pnand %p1795_p2, %p1789_p13 }
  0x46   :  { %1799 = shalt.err (!%p1796_p3)
}
  0x47   :  { %37 = dma.hbm_to_vmem [thread:$0]  %s2642_s0, 128, %s35_s1, [#allocation4]  }
  0x48   :  { %s1800_s26 = scalar_lea.hbm %s2644_s2, 2048 }
  0x49   :  { %p1801_p4 = scmp.ne.s32.totalorder %s2644_s2, %s1800_s26  ;;  %p1804_p5 = scmp.lt.u32.totalorder %s1800_s26, %s2644_s2 }
  0x4b   :  { %p1806_p6 = pnand %p1804_p5, %p1801_p4 }
  0x4d   :  { %1809 = shalt.err (!%p1806_p6)
}
  0x4e   :  { %s1810_s21 = scalar_lea.vmem %s54_s29, 2048  ;;  %p1815_p8 = scmp.lt.s32.totalorder %s54_s29, %s54_s29 }
  0x4f   :  { %p1811_p7 = scmp.ne.s32.totalorder %s54_s29, %s1810_s21  ;;  %p1816_p9 = scmp.lt.s32.totalorder %s1810_s21, %s1810_s21 }
  0x51   :  { %p1817_p10 = por %p1816_p9, %p1815_p8 }
  0x53   :  { %p1818_p11 = pnand %p1817_p10, %p1811_p7 }
  0x55   :  { %1821 = shalt.err (!%p1818_p11)
}
  0x56   :  { %59 = dma.hbm_to_vmem [thread:$0]  %s2644_s2, 2048, %s54_s29, [#allocation7], %s1971_s19, %s1971_s19, %s1972_s27  }
  0x57   :  { %s1975_s22 = smov [#allocation11]   ;;  %s1976_s24 = smov [#allocation14]  }
  0x58   :  { %s77_s23 = sshll.u32 %s1975_s22, 4  ;;  %s105_s5 = sshll.u32 %s1976_s24, 4  ;;  %s78_s23 = int_to_ptr.vmem [resolvable:$true] %s77_s23  ;;  %s106_s5 = int_to_ptr.vmem [resolvable:$true] %s105_s5 }
  0x59   :  { %s1822_s3 = scalar_lea.hbm %s2646_s4, 512 }
  0x5a   :  { %p1823_p12 = scmp.ne.s32.totalorder %s2646_s4, %s1822_s3  ;;  %p1826_p13 = scmp.lt.u32.totalorder %s1822_s3, %s2646_s4 }
  0x5c   :  { %p1828_p0 = pnand %p1826_p13, %p1823_p12 }
  0x5e   :  { %1831 = shalt.err (!%p1828_p0)
}
  0x5f   :  { %s1832_s2 = scalar_lea.vmem %s78_s23, 512  ;;  %p1837_p2 = scmp.lt.s32.totalorder %s78_s23, %s78_s23 }
  0x60   :  { %p1833_p1 = scmp.ne.s32.totalorder %s78_s23, %s1832_s2  ;;  %p1838_p3 = scmp.lt.s32.totalorder %s1832_s2, %s1832_s2 }
  0x62   :  { %p1839_p4 = por %p1838_p3, %p1837_p2 }
  0x64   :  { %p1840_p5 = pnand %p1839_p4, %p1833_p1 }
  0x66   :  { %1843 = shalt.err (!%p1840_p5)
}
  0x67   :  { %83 = dma.hbm_to_vmem [thread:$0]  %s2646_s4, 512, %s78_s23, [#allocation10], %s1971_s19, %s1971_s19, %s1972_s27  }
  0x68   :  { %s1844_s0 = scalar_lea.hbm %s2650_s8, 512 }
  0x69   :  { %p1845_p6 = scmp.ne.s32.totalorder %s2650_s8, %s1844_s0  ;;  %p1848_p7 = scmp.lt.u32.totalorder %s1844_s0, %s2650_s8 }
  0x6b   :  { %p1850_p8 = pnand %p1848_p7, %p1845_p6 }
  0x6d   :  { %1853 = shalt.err (!%p1850_p8)
}
  0x6e   :  { %s1854_s25 = scalar_lea.vmem %s106_s5, 512  ;;  %p1859_p10 = scmp.lt.s32.totalorder %s106_s5, %s106_s5 }
  0x6f   :  { %p1855_p9 = scmp.ne.s32.totalorder %s106_s5, %s1854_s25  ;;  %p1860_p11 = scmp.lt.s32.totalorder %s1854_s25, %s1854_s25 }
  0x71   :  { %p1861_p12 = por %p1860_p11, %p1859_p10 }
  0x73   :  { %p1862_p13 = pnand %p1861_p12, %p1855_p9 }
  0x75   :  { %1865 = shalt.err (!%p1862_p13)
}
  0x76   :  { %111 = dma.hbm_to_vmem [thread:$0]  %s2650_s8, 512, %s106_s5, [#allocation13], %s1971_s19, %s1971_s19, %s1972_s27  }
  0x77   :  { %s1977_s3 = smov [#allocation15]   ;;  %s1866_s30 = scalar_lea.hbm %s2653_s11, 1024 }
  0x78   :  { %s121_s16 = sshll.u32 %s1977_s3, 4  ;;  %p1867_p0 = scmp.ne.s32.totalorder %s2653_s11, %s1866_s30  ;;  %s122_s16 = int_to_ptr.vmem [resolvable:$true] %s121_s16 }
  0x79   :  { %p1870_p1 = scmp.lt.u32.totalorder %s1866_s30, %s2653_s11 }
  0x7b   :  { %p1872_p2 = pnand %p1870_p1, %p1867_p0 }
  0x7d   :  { %1875 = shalt.err (!%p1872_p2)
}
  0x7e   :  { %s1876_s21 = scalar_lea.vmem %s122_s16, 1024  ;;  %p1881_p4 = scmp.lt.s32.totalorder %s122_s16, %s122_s16 }
  0x7f   :  { %p1877_p3 = scmp.ne.s32.totalorder %s122_s16, %s1876_s21  ;;  %p1882_p5 = scmp.lt.s32.totalorder %s1876_s21, %s1876_s21 }
  0x81   :  { %p1883_p6 = por %p1882_p5, %p1881_p4 }
  0x83   :  { %p1884_p7 = pnand %p1883_p6, %p1877_p3 }
  0x85   :  { %1887 = shalt.err (!%p1884_p7)
}
  0x86   :  { %127 = dma.hbm_to_vmem [thread:$0]  %s2653_s11, 1024, %s122_s16, [#allocation16], %s1971_s19, %s1971_s19, %s1972_s27  }
  0x87   :  { %1954 = dma.done.wait [#allocation4], 128  }
  0x88   :  { %1955 = vsyncadd [#allocation4], 4294967168 }
  0x89   :  { %1956 = dma.done.wait [#allocation7], 2176  }
  0x8a   :  { %1957 = vsyncadd [#allocation7], 4294965120 }
  0x8b   :  { %1958 = dma.done.wait [#allocation10], 2560  }
  0x8c   :  { %1959 = vsyncadd [#allocation10], 4294964736 }
  0x8d   :  { %1960 = dma.done.wait [#allocation13], 1024  }
  0x8e   :  { %1961 = vsyncadd [#allocation13], 4294966272 }
  0x8f   :  { %1962 = dma.done.wait [#allocation16], 1024  }
  0x90   :  { %1963 = vsyncadd [#allocation16], 4294966272  ;;  %v1978_v0 = vmov 0.0|0.0   ;;  %vm1979_vm0 = vmmov 0   ;;  %v1980_v1 = vmov 0.0   ;;  %v161_v2 = vld [vmem:[#allocation11] sm:$0xff]  ;;  %v484_v49 = vlaneseq }
  0x91   :  { %1574 = vmatprep.subr.bf16.mxu0 %v1978_v0  ;;  %1549 = vmatprep.mubr.msk.f32.mxu0 %vm1979_vm0, %v1980_v1  ;;  %v162_v3 = vld [vmem:[#allocation11 + $0x8] sm:$0xff]  ;;  %v163_v4 = vld [vmem:[#allocation11 + $0x10] sm:$0xff]  ;;  %v164_v6 = vld [vmem:[#allocation11 + $0x18] sm:$0xff]  ;;  %vm172_vm1 = vcmask 261120   ;;  %s1981_s27 = smov 64   ;;  %vm699_vm2 = vcmask 130112  }
  0x92   :  { %v1575_v5 = vpack.c.bf16 %v162_v3, %v161_v2  ;;  %v1578_v7 = vpack.c.bf16 %v164_v6, %v163_v4  ;;  %v246_v8 = vld [vmem:[#allocation12] sm:$0xff]  ;;  %v247_v9 = vld [vmem:[#allocation12 + $0x8] sm:$0xff]  ;;  %v159_v10 = vld [vmem:[#allocation3] sm:$0xff]  ;;  %v1984_v47 = vmov 1966171168   ;;  %v2202_v51 = vshrl.u32 %v484_v49, 7 }
  0x93   :  { %v1581_v11 = vpack.c.bf16 %v247_v9, %v246_v8  ;;  %v248_v12 = vld [vmem:[#allocation12 + $0x10] sm:$0xff]  ;;  %v249_v13 = vld [vmem:[#allocation12 + $0x18] sm:$0xff]  ;;  %v1511_v18 = vld [vmem:[%s2649_s7] ss:$0 sm:$0xff]  ;;  %s1983_s7 = smov 32   ;;  %v482_v48 = vunpack.c.l.s4 %v1984_v47  ;;  %vm764_vm3 = vcmask 1041409  }
  0x94   :  { %1576 = vmatpush3.bf16.msra.mxu0 %v1575_v5  ;;  %v1584_v14 = vpack.c.bf16 %v249_v13, %v248_v12  ;;  %v160_v15 = vld [vmem:[#allocation6] sm:$0xff]  ;;  %v1509_v22 = vld [vmem:[%s2648_s6] ss:$0 sm:$0xff]  ;;  %v396_v33 = vld [vmem:[#allocation14] sm:$0xff]  ;;  %s1982_s6 = smov 96   ;;  %v2209_v59 = vsub.s32 0, %v2202_v51 }
  0x95   :  { %1577 = vmatprep.subr.bf16.mxu0 %v1978_v0  ;;  %v397_v34 = vld [vmem:[#allocation14 + $0x8] sm:$0xff]  ;;  %v398_v35 = vld [vmem:[#allocation14 + $0x10] sm:$0xff]  ;;  %v399_v37 = vld [vmem:[#allocation14 + $0x18] sm:$0xff]  ;;  %v483_v50 = vunpack.c.0.s8 %v482_v48  ;;  %vm766_vm4 = vcmask 1042434   ;;  %vm768_vm5 = vcmask 1043459   ;;  %vm770_vm6 = vcmask 1044484  }
  0x96   :  { %v1587_v36 = vpack.c.bf16 %v397_v34, %v396_v33  ;;  %v1590_v38 = vpack.c.bf16 %v399_v37, %v398_v35  ;;  %v1514_v52 = vld [vmem:[%s2651_s9] ss:$0 sm:$0xff]  ;;  %v382_v5 = vld [vmem:[#allocation9 + $0x10] sm:$0xff]  ;;  %v383_v6 = vld [vmem:[#allocation9 + $0x18] sm:$0xff]  ;;  %vm772_vm7 = vcmask 1045509   ;;  %vm774_vm8 = vcmask 1046534  }
  0x97   :  { %v486_v53 = vsub.s32 %v483_v50, %v2202_v51  ;;  %v381_v3 = vld [vmem:[#allocation9 + $0x8] sm:$0xff]  ;;  %v390_v35 = vld [vmem:[#allocation9 + $0x50] sm:$0xff]  ;;  %v392_v50 = vld [vmem:[#allocation9 + $0x60] sm:$0xff]  ;;  %vm776_vm9 = vcmask 1047559   ;;  %vm779_vm10 = vcmask 130048   ;;  %vm1353_vm11 = vcmask 519168  }
  0x98   :  { %1579 = vmatpush3.bf16.msra.mxu0 %v1578_v7  ;;  %v385_v12 = vld [vmem:[#allocation9 + $0x28] sm:$0xff]  ;;  %vm1416_vm12 = vcmask 523264  }
  0x99   :  { %1580 = vmatprep.subr.bf16.mxu0 %v1978_v0 }
  0x9b   :  { %1550 = vmatmul.mubr.msk.f32.vlgmr.msra.gmra.mrb[0].mxu0 %vm172_vm1, %v159_v10  ;;  %v384_v10 = vld [vmem:[#allocation9 + $0x20] sm:$0xff] }
  0x9c   :  { %1582 = vmatpush3.bf16.msra.mxu0 %v1581_v11  ;;  %1560 = vmatprep.mubr.msk.f32.mxu0 %vm1979_vm0, %v1980_v1 }
  0x9d   :  { %1583 = vmatprep.subr.bf16.mxu0 %v1978_v0 }
  0xa0   :  { %1585 = vmatpush3.bf16.msra.mxu0 %v1584_v14 }
  0xa1   :  { %1586 = vmatprep.subr.bf16.mxu0 %v1978_v0 }
  0xa3   :  { %1561 = vmatmul.mubr.msk.f32.vlgmr.msra.gmra.mrb[2].mxu0 %vm172_vm1, %v160_v15 }
  0xa4   :  { %1571 = vmatprep.mubr.msk.f32.mxu0 %vm1979_vm0, %v1980_v1  ;;  %1588 = vmatpush3.bf16.msra.mxu0 %v1587_v36  ;;  %v380_v1 = vld [vmem:[#allocation9] sm:$0xff] }
  0xa5   :  { %1589 = vmatprep.subr.bf16.mxu0 %v1978_v0 }
  0xa8   :  { %1591 = vmatpush3.bf16.msra.mxu0 %v1590_v38 }
 0x16e   :  { %v242_v16 = vpop.f32.mrb[0].mxu0 }
 0x16f   :  { %v1551_v17 = vpop.f32.mrb[1].mxu0  ;;  %v243_v23 = vadd.f32 %v1509_v22, %v242_v16 }
 0x176   :  { %v326_v19 = vpop.f32.mrb[2].mxu0 }
 0x177   :  { %v327_v20 = vadd.f32 %v1511_v18, %v326_v19  ;;  %v1562_v21 = vpop.f32.mrb[3].mxu0  ;;  %v388_v19 = vld [vmem:[#allocation9 + $0x40] sm:$0xff] }
 0x178   :  { %v389_v21 = vld [vmem:[#allocation9 + $0x48] sm:$0xff] }
 0x179   :  { %338 = vrot.lane.b32.xlu0 %v327_v20, %s1981_s27  ;;  %v330_v24 = vadd.f32 %v327_v20, %v243_v23 }
 0x17b   :  { %v1513_v25 = vmul.f32 -1.442695, %v330_v24 }
 0x17d   :  { %1626 = vpow2.f32 %v1513_v25  ;;  %v387_v25 = vld [vmem:[#allocation9 + $0x38] sm:$0xff] }
 0x187   :  { %v1627_v26 = vpop.eup %1626 }
 0x188   :  { %v334_v27 = vadd.f32 1.0, %v1627_v26 }
 0x18a   :  { %1628 = vrcp.f32 %v334_v27  ;;  %v386_v27 = vld [vmem:[#allocation9 + $0x30] sm:$0xff] }
 0x194   :  { %v1629_v28 = vpop.eup %1628 }
 0x195   :  { %v348_v41 = vsub.f32 1.0, %v1629_v28 }
 0x1eb   :  { %v339_v29 = vpop.permute.xlu0 %338 }
 0x1ec   :  { %v341_v30 = vmul.f32 %v1629_v28, %v339_v29 }
 0x1ee   :  { %343 = vrot.lane.b32.xlu0 %v341_v30, %s1981_s27 }
 0x260   :  { %v344_v31 = vpop.permute.xlu0 %343 }
 0x261   :  { %v346_v32 = vadd.f32 %v344_v31, %v243_v23  ;;  %v2220_v31 = vld [vmem:[%s2652_s10] ss:$0 sm:$0xff]  ;;  %s1986_s10 = smov [#allocation18]  }
 0x262   :  { %s1479_s25 = sshll.u32 %s1986_s10, 4  ;;  %s1480_s25 = int_to_ptr.vmem [resolvable:$true] %s1479_s25 }
 0x263   :  { %1630 = vtanh.f32 %v346_v32  ;;  %v391_v32 = vld [vmem:[#allocation9 + $0x58] sm:$0xff]  ;;  %s1888_s4 = scalar_lea.vmem %s1480_s25, 128  ;;  %p1893_p9 = scmp.lt.s32.totalorder %s1480_s25, %s1480_s25 }
 0x264   :  { %p1889_p8 = scmp.ne.s32.totalorder %s1480_s25, %s1888_s4  ;;  %p1894_p10 = scmp.lt.s32.totalorder %s1888_s4, %s1888_s4 }
 0x266   :  { %p1895_p11 = por %p1894_p10, %p1893_p9 }
 0x268   :  { %p1896_p12 = pnand %p1895_p11, %p1889_p8 }
 0x26d   :  { %v1631_v39 = vpop.eup %1630 }
 0x26e   :  { %350 = vrot.lane.b32.xlu1 %v1631_v39, %s1982_s6 }
 0x272   :  { %354 = vrot.lane.b32.xlu1 %v160_v15, %s1983_s7 }
 0x2e0   :  { %v351_v40 = vpop.permute.xlu1 %350 }
 0x2e1   :  { %v353_v43 = vmul.f32 %v351_v40, %v348_v41 }
 0x2e4   :  { %v355_v42 = vpop.permute.xlu1 %354 }
 0x2e5   :  { %v357_v44 = vmul.f32 %v1629_v28, %v355_v42 }
 0x2e7   :  { %v358_v45 = vadd.f32 %v357_v44, %v353_v43  ;;  %v393_v44 = vld [vmem:[#allocation9 + $0x68] sm:$0xff] }
 0x2e9   :  { %360 = vrot.lane.b32.xlu0 %v358_v45, %s1982_s6 }
 0x35b   :  { %v2195_v46 = vpop.permute.xlu0 %360 }
 0x35c   :  { %363 = vst.msk [vmem:[#allocation18] sm:$0xff] %vm172_vm1, %v2195_v46  ;;  %1572 = vmatmul.mubr.msk.f32.vlgmr.msra.gmra.mrb[4].mxu0 %vm172_vm1, %v2195_v46 }
 0x42f   :  { %v475_v54 = vpop.f32.mrb[4].mxu0 }
 0x430   :  { %v476_v55 = vadd.f32 %v1514_v52, %v475_v54  ;;  %v1573_v56 = vpop.f32.mrb[5].mxu0 }
 0x432   :  { %v480_v57 = vcombine.high %v476_v55, %v476_v55  ;;  %v487_v58 = vrot.slane %v476_v55, %v486_v53 }
 0x434   :  { %v495_v60 = vcombine.high %v487_v58, %v487_v58  ;;  %v503_v61 = vrot.slane %v487_v58, %v486_v53  ;;  %v494_v62 = vrot.slane %v480_v57, %v486_v53 }
 0x436   :  { %v517_v63 = vrot.slane %v495_v60, %v486_v53  ;;  %v525_v0 = vcombine.high %v503_v61, %v503_v61  ;;  %v532_v2 = vrot.slane %v503_v61, %v2209_v59  ;;  %v510_v7 = vrot.slane %v494_v62, %v486_v53 }
 0x437   :  { %v496_v14 = vcombine.high %v494_v62, %v494_v62  ;;  %v395_v62 = vld [vmem:[#allocation9 + $0x78] sm:$0xff] }
 0x438   :  { %v536_v4 = vrot.slane %v517_v63, %v2209_v59  ;;  %v540_v8 = vrot.slane %v525_v0, %v2209_v59  ;;  %v569_v9 = vadd.f32 %v532_v2, %v380_v1  ;;  %v570_v11 = vadd.f32 %v532_v2, %v381_v3  ;;  %v394_v2 = vld [vmem:[#allocation9 + $0x70] sm:$0xff] }
 0x439   :  { %v527_v16 = vcombine.high %v517_v63, %v517_v63  ;;  %v548_v17 = vrot.slane %v510_v7, %v2209_v59  ;;  %v524_v22 = vrot.slane %v496_v14, %v486_v53  ;;  %v526_v28 = vcombine.high %v510_v7, %v510_v7 }
 0x43a   :  { %v571_v13 = vadd.f32 %v536_v4, %v382_v5  ;;  %v572_v15 = vadd.f32 %v536_v4, %v383_v6  ;;  %v573_v18 = vadd.f32 %v540_v8, %v384_v10  ;;  %1632 = vtanh.f32 %v569_v9 }
 0x43b   :  { %v574_v20 = vadd.f32 %v540_v8, %v385_v12  ;;  %1634 = vtanh.f32 %v570_v11  ;;  %v544_v23 = vrot.slane %v527_v16, %v2209_v59  ;;  %v577_v24 = vadd.f32 %v548_v17, %v388_v19 }
 0x43c   :  { %1636 = vtanh.f32 %v571_v13  ;;  %v578_v26 = vadd.f32 %v548_v17, %v389_v21  ;;  %v552_v29 = vrot.slane %v524_v22, %v2209_v59  ;;  %v528_v37 = vcombine.high %v524_v22, %v524_v22 }
 0x43d   :  { %1638 = vtanh.f32 %v572_v15  ;;  %v576_v30 = vadd.f32 %v544_v23, %v387_v25  ;;  %v575_v33 = vadd.f32 %v544_v23, %v386_v27  ;;  %v556_v40 = vrot.slane %v526_v28, %v2209_v59 }
 0x43e   :  { %1640 = vtanh.f32 %v573_v18  ;;  %v580_v41 = vadd.f32 %v552_v29, %v391_v32  ;;  %v579_v45 = vadd.f32 %v552_v29, %v390_v35  ;;  %v560_v56 = vrot.slane %v528_v37, %v2209_v59 }
 0x43f   :  { %1642 = vtanh.f32 %v574_v20  ;;  %v582_v57 = vadd.f32 %v556_v40, %v393_v44  ;;  %v581_v58 = vadd.f32 %v556_v40, %v392_v50 }
 0x440   :  { %1644 = vtanh.f32 %v577_v24  ;;  %v584_v4 = vadd.f32 %v560_v56, %v395_v62  ;;  %v583_v7 = vadd.f32 %v560_v56, %v394_v2 }
 0x441   :  { %1646 = vtanh.f32 %v578_v26 }
 0x442   :  { %1648 = vtanh.f32 %v576_v30 }
 0x443   :  { %1650 = vtanh.f32 %v575_v33 }
 0x444   :  { %v1633_v34 = vpop.eup %1632  ;;  %1652 = vtanh.f32 %v580_v41  ;;  %v689_v41 = vand.u32 127, %v484_v49 }
 0x445   :  { %v1635_v36 = vpop.eup %1634  ;;  %v608_v38 = vmul.f32 %v1633_v34, %v2220_v31  ;;  %1654 = vtanh.f32 %v579_v45 }
 0x446   :  { %v1637_v39 = vpop.eup %1636  ;;  %v609_v42 = vmul.f32 %v1635_v36, %v2220_v31  ;;  %1656 = vtanh.f32 %v582_v57 }
 0x447   :  { %v1639_v43 = vpop.eup %1638  ;;  %v624_v47 = vsel %vm172_vm1, %v608_v38, 0.0  ;;  %v610_v54 = vmul.f32 %v1637_v39, %v2220_v31  ;;  %1658 = vtanh.f32 %v581_v58 }
 0x448   :  { %v1641_v48 = vpop.eup %1640  ;;  %v627_v52 = vsel %vm172_vm1, %v609_v42, 0.0  ;;  %625 = vadd.xlane.f32.xlu1 %v624_v47  ;;  %v611_v53 = vmul.f32 %v1639_v43, %v2220_v31  ;;  %1660 = vtanh.f32 %v584_v4  ;;  %v694_v43 = vadd.s32 4294967288, %v689_v41 }
 0x449   :  { %v1643_v55 = vpop.eup %1642  ;;  %628 = vadd.xlane.f32.xlu0 %v627_v52  ;;  %v630_v0 = vsel %vm172_vm1, %v610_v54, 0.0  ;;  %v612_v1 = vmul.f32 %v1641_v48, %v2220_v31  ;;  %1662 = vtanh.f32 %v583_v7  ;;  %v2274_v47 = vsub.s32 %v689_v41, %v2202_v51 }
 0x44a   :  { %v633_v60 = vsel %vm172_vm1, %v611_v53, 0.0  ;;  %v613_v61 = vmul.f32 %v1643_v55, %v2220_v31  ;;  %v1645_v63 = vpop.eup %1644  ;;  %v2277_v48 = vsub.s32 %v694_v43, %v2202_v51  ;;  %v810_v43 = vsub.s32 6, %v2202_v51 }
 0x44b   :  { %v1647_v3 = vpop.eup %1646  ;;  %v636_v9 = vsel %vm172_vm1, %v612_v1, 0.0  ;;  %v616_v10 = vmul.f32 %v1645_v63, %v2220_v31 }
 0x44c   :  { %634 = vadd.xlane.f32.xlu1 %v633_v60  ;;  %v639_v5 = vsel %vm172_vm1, %v613_v61, 0.0  ;;  %v617_v6 = vmul.f32 %v1647_v3, %v2220_v31  ;;  %v1649_v8 = vpop.eup %1648 }
 0x44d   :  { %631 = vadd.xlane.f32.xlu0 %v630_v0  ;;  %v1651_v11 = vpop.eup %1650  ;;  %v615_v13 = vmul.f32 %v1649_v8, %v2220_v31  ;;  %v648_v15 = vsel %vm172_vm1, %v616_v10, 0.0 }
 0x44e   :  { %v651_v12 = vsel %vm172_vm1, %v617_v6, 0.0  ;;  %v1653_v14 = vpop.eup %1652  ;;  %v614_v16 = vmul.f32 %v1651_v11, %v2220_v31 }
 0x44f   :  { %v1655_v17 = vpop.eup %1654  ;;  %v645_v18 = vsel %vm172_vm1, %v615_v13, 0.0  ;;  %v619_v19 = vmul.f32 %v1653_v14, %v2220_v31 }
 0x450   :  { %640 = vadd.xlane.f32.xlu1 %v639_v5  ;;  %v1657_v20 = vpop.eup %1656  ;;  %v642_v21 = vsel %vm172_vm1, %v614_v16, 0.0  ;;  %v618_v22 = vmul.f32 %v1655_v17, %v2220_v31 }
 0x451   :  { %637 = vadd.xlane.f32.xlu0 %v636_v9  ;;  %v1659_v23 = vpop.eup %1658  ;;  %v657_v24 = vsel %vm172_vm1, %v619_v19, 0.0  ;;  %v621_v25 = vmul.f32 %v1657_v20, %v2220_v31 }
 0x452   :  { %v1661_v26 = vpop.eup %1660  ;;  %v654_v27 = vsel %vm172_vm1, %v618_v22, 0.0  ;;  %v620_v28 = vmul.f32 %v1659_v23, %v2220_v31 }
 0x453   :  { %v1663_v29 = vpop.eup %1662  ;;  %v663_v30 = vsel %vm172_vm1, %v621_v25, 0.0  ;;  %v623_v32 = vmul.f32 %v1661_v26, %v2220_v31 }
 0x454   :  { %652 = vadd.xlane.f32.xlu1 %v651_v12  ;;  %v660_v33 = vsel %vm172_vm1, %v620_v28, 0.0  ;;  %v622_v34 = vmul.f32 %v1663_v29, %v2220_v31  ;;  %v2338_v28 = vsub.s32 1, %v2202_v51 }
 0x455   :  { %649 = vadd.xlane.f32.xlu0 %v648_v15  ;;  %v669_v35 = vsel %vm172_vm1, %v623_v32, 0.0 }
 0x456   :  { %v666_v36 = vsel %vm172_vm1, %v622_v34, 0.0 }
 0x458   :  { %646 = vadd.xlane.f32.xlu1 %v645_v18 }
 0x459   :  { %643 = vadd.xlane.f32.xlu0 %v642_v21 }
 0x45c   :  { %658 = vadd.xlane.f32.xlu1 %v657_v24 }
 0x45d   :  { %655 = vadd.xlane.f32.xlu0 %v654_v27  ;;  %v1985_v27 = vmov 0  }
 0x45e   :  { %1614 = vset.pattern.permute.xlu0 %v1985_v27  ;;  %1613 = vset.pattern.permute.xlu1 %v1985_v27 }
 0x45f   :  { %1452 = vmatprep.mubr.bf16.mxu1 %v1985_v27 }
 0x460   :  { %664 = vadd.xlane.f32.xlu1 %v663_v30 }
 0x461   :  { %661 = vadd.xlane.f32.xlu0 %v660_v33  ;;  %v806_v33 = vsub.s32 5, %v2202_v51 }
 0x464   :  { %670 = vadd.xlane.f32.xlu1 %v669_v35 }
 0x465   :  { %667 = vadd.xlane.f32.xlu0 %v666_v36  ;;  %v794_v36 = vsub.s32 2, %v2202_v51 }
 0x4d5   :  { %v2256_v37 = vpop.xlane.xlu1 %625 }
 0x4d6   :  { %v2258_v38 = vpop.xlane.xlu0 %628  ;;  %v693_v57 = vrot.slane %v2256_v37, %v2274_v47 }
 0x4d7   :  { %v698_v56 = vrot.slane %v2258_v38, %v2277_v48 }
 0x4d9   :  { %v2260_v39 = vpop.xlane.xlu1 %634  ;;  %v700_v1 = vsel %vm699_vm2, %v698_v56, %v693_v57 }
 0x4da   :  { %v2262_v40 = vpop.xlane.xlu0 %631  ;;  %v708_v49 = vrot.slane %v2260_v39, %v2277_v48 }
 0x4db   :  { %v704_v53 = vrot.slane %v2262_v40, %v2274_v47 }
 0x4dd   :  { %v2265_v42 = vpop.xlane.xlu1 %640  ;;  %v709_v63 = vsel %vm699_vm2, %v708_v49, %v704_v53 }
 0x4de   :  { %v2267_v31 = vpop.xlane.xlu0 %637  ;;  %v717_v54 = vrot.slane %v2265_v42, %v2277_v48  ;;  %v765_v6 = vsel %vm764_vm3, %v709_v63, %v700_v1 }
 0x4df   :  { %v713_v55 = vrot.slane %v2267_v31, %v2274_v47 }
 0x4e1   :  { %v2269_v44 = vpop.xlane.xlu1 %652  ;;  %v718_v0 = vsel %vm699_vm2, %v717_v54, %v713_v55 }
 0x4e2   :  { %v2271_v45 = vpop.xlane.xlu0 %649  ;;  %v735_v7 = vrot.slane %v2269_v44, %v2277_v48  ;;  %v767_v11 = vsel %vm766_vm4, %v718_v0, %v765_v6 }
 0x4e3   :  { %v731_v8 = vrot.slane %v2271_v45, %v2274_v47 }
 0x4e5   :  { %v2279_v50 = vpop.xlane.xlu1 %646  ;;  %v736_v16 = vsel %vm699_vm2, %v735_v7, %v731_v8  ;;  %v802_v8 = vsub.s32 4, %v2202_v51 }
 0x4e6   :  { %v2281_v52 = vpop.xlane.xlu0 %643  ;;  %v726_v58 = vrot.slane %v2279_v50, %v2277_v48 }
 0x4e7   :  { %v722_v60 = vrot.slane %v2281_v52, %v2274_v47 }
 0x4e9   :  { %v2299_v61 = vpop.xlane.xlu1 %658  ;;  %v727_v2 = vsel %vm699_vm2, %v726_v58, %v722_v60  ;;  %v798_v58 = vsub.s32 3, %v2202_v51 }
 0x4ea   :  { %v2301_v62 = vpop.xlane.xlu0 %655  ;;  %v744_v3 = vrot.slane %v2299_v61, %v2277_v48  ;;  %v769_v13 = vsel %vm768_vm5, %v727_v2, %v767_v11 }
 0x4eb   :  { %v740_v4 = vrot.slane %v2301_v62, %v2274_v47  ;;  %v771_v21 = vsel %vm770_vm6, %v736_v16, %v769_v13 }
 0x4ed   :  { %v2311_v5 = vpop.xlane.xlu1 %664  ;;  %v745_v14 = vsel %vm699_vm2, %v744_v3, %v740_v4 }
 0x4ee   :  { %v753_v9 = vrot.slane %v2311_v5, %v2277_v48  ;;  %v662_v10 = vpop.xlane.xlu0 %661  ;;  %v773_v22 = vsel %vm772_vm7, %v745_v14, %v771_v21 }
 0x4ef   :  { %v749_v12 = vrot.slane %v662_v10, %v2274_v47 }
 0x4f1   :  { %v2324_v15 = vpop.xlane.xlu1 %670  ;;  %v754_v19 = vsel %vm699_vm2, %v753_v9, %v749_v12 }
 0x4f2   :  { %v762_v17 = vrot.slane %v2324_v15, %v2277_v48  ;;  %v668_v18 = vpop.xlane.xlu0 %667  ;;  %v775_v24 = vsel %vm774_vm8, %v754_v19, %v773_v22 }
 0x4f3   :  { %v758_v20 = vrot.slane %v668_v18, %v2274_v47 }
 0x4f5   :  { %v763_v23 = vsel %vm699_vm2, %v762_v17, %v758_v20 }
 0x4f6   :  { %v777_v25 = vsel %vm776_vm9, %v763_v23, %v775_v24 }
 0x4f7   :  { %v780_v26 = vsel %vm779_vm10, %v777_v25, -inf }
 0x4f8   :  { %781 = vmax.xlane.f32.xlu0 %v780_v26 }
 0x585   :  { %v782_v29 = vpop.xlane.xlu0 %781 }
 0x586   :  { %v787_v30 = vrot.slane %v782_v29, %v2209_v59  ;;  %v791_v32 = vrot.slane %v782_v29, %v2338_v28  ;;  %v2350_v49 = vrot.slane %v782_v29, %v806_v33  ;;  %v795_v55 = vrot.slane %v782_v29, %v794_v36 }
 0x587   :  { %v799_v2 = vrot.slane %v782_v29, %v798_v58  ;;  %v803_v12 = vrot.slane %v782_v29, %v802_v8 }
 0x588   :  { %v824_v34 = vsub.f32 %v2256_v37, %v787_v30  ;;  %v825_v35 = vsub.f32 %v2258_v38, %v787_v30  ;;  %v826_v41 = vsub.f32 %v2262_v40, %v791_v32  ;;  %v827_v56 = vsub.f32 %v2260_v39, %v791_v32 }
 0x589   :  { %v814_v38 = vsub.s32 7, %v2202_v51  ;;  %v2358_v40 = vrot.slane %v782_v29, %v810_v43  ;;  %v834_v57 = vsub.f32 %v2301_v62, %v2350_v49  ;;  %v828_v60 = vsub.f32 %v2267_v31, %v795_v55 }
 0x58a   :  { %v840_v53 = vmul.f32 1.442695, %v824_v34  ;;  %v842_v54 = vmul.f32 1.442695, %v825_v35  ;;  %v844_v37 = vmul.f32 1.442695, %v826_v41  ;;  %v829_v3 = vsub.f32 %v2265_v42, %v795_v55 }
 0x58b   :  { %v846_v63 = vmul.f32 1.442695, %v827_v56  ;;  %v815_v39 = vrot.slane %v782_v29, %v814_v38  ;;  %v836_v0 = vsub.f32 %v662_v10, %v2358_v40  ;;  %v860_v1 = vmul.f32 1.442695, %v834_v57 }
 0x58c   :  { %1664 = vpow2.f32 %v840_v53  ;;  %v848_v4 = vmul.f32 1.442695, %v828_v60  ;;  %v830_v9 = vsub.f32 %v2281_v52, %v799_v2  ;;  %v850_v10 = vmul.f32 1.442695, %v829_v3 }
 0x58d   :  { %1666 = vpow2.f32 %v842_v54  ;;  %v838_v6 = vsub.f32 %v668_v18, %v815_v39  ;;  %v864_v31 = vmul.f32 1.442695, %v836_v0  ;;  %v831_v13 = vsub.f32 %v2279_v50, %v799_v2 }
 0x58e   :  { %1668 = vpow2.f32 %v844_v37  ;;  %v852_v14 = vmul.f32 1.442695, %v830_v9  ;;  %v832_v17 = vsub.f32 %v2271_v45, %v803_v12  ;;  %v833_v20 = vsub.f32 %v2269_v44, %v803_v12 }
 0x58f   :  { %1670 = vpow2.f32 %v846_v63  ;;  %v868_v11 = vmul.f32 1.442695, %v838_v6  ;;  %v854_v18 = vmul.f32 1.442695, %v831_v13  ;;  %v835_v23 = vsub.f32 %v2299_v61, %v2350_v49 }
 0x590   :  { %1672 = vpow2.f32 %v860_v1  ;;  %v856_v21 = vmul.f32 1.442695, %v832_v17  ;;  %v858_v24 = vmul.f32 1.442695, %v833_v20  ;;  %v837_v44 = vsub.f32 %v2311_v5, %v2358_v40 }
 0x591   :  { %1674 = vpow2.f32 %v848_v4  ;;  %v862_v26 = vmul.f32 1.442695, %v835_v23  ;;  %v839_v29 = vsub.f32 %v2324_v15, %v815_v39 }
 0x592   :  { %1676 = vpow2.f32 %v864_v31  ;;  %v866_v61 = vmul.f32 1.442695, %v837_v44 }
 0x593   :  { %1678 = vpow2.f32 %v850_v10  ;;  %v870_v32 = vmul.f32 1.442695, %v839_v29 }
 0x594   :  { %1680 = vpow2.f32 %v868_v11 }
 0x595   :  { %1682 = vpow2.f32 %v852_v14 }
 0x596   :  { %v2370_v62 = vpop.eup %1664  ;;  %1684 = vpow2.f32 %v854_v18 }
 0x597   :  { %v2372_v7 = vpop.eup %1666  ;;  %889 = vperm.xlu1 %1613, %v2370_v62   ;;  %1686 = vpow2.f32 %v856_v21 }
 0x598   :  { %892 = vperm.xlu0 %1614, %v2372_v7   ;;  %v2378_v42 = vpop.eup %1668  ;;  %1688 = vpow2.f32 %v858_v24 }
 0x599   :  { %v2384_v16 = vpop.eup %1670  ;;  %1690 = vpow2.f32 %v862_v26 }
 0x59a   :  { %v2387_v52 = vpop.eup %1672  ;;  %1692 = vpow2.f32 %v866_v61 }
 0x59b   :  { %895 = vperm.xlu1 %1613, %v2378_v42   ;;  %v2391_v19 = vpop.eup %1674  ;;  %1694 = vpow2.f32 %v870_v32 }
 0x59c   :  { %919 = vperm.xlu0 %1614, %v2387_v52   ;;  %v2394_v50 = vpop.eup %1676 }
 0x59d   :  { %v2398_v22 = vpop.eup %1678 }
 0x59e   :  { %v2401_v45 = vpop.eup %1680 }
 0x59f   :  { %898 = vperm.xlu1 %1613, %v2384_v16   ;;  %v2406_v25 = vpop.eup %1682 }
 0x5a0   :  { %925 = vperm.xlu0 %1614, %v2394_v50   ;;  %v2411_v27 = vpop.eup %1684 }
 0x5a1   :  { %v2415_v30 = vpop.eup %1686 }
 0x5a2   :  { %v2418_v34 = vpop.eup %1688 }
 0x5a3   :  { %901 = vperm.xlu1 %1613, %v2391_v19   ;;  %v2421_v5 = vpop.eup %1690 }
 0x5a4   :  { %931 = vperm.xlu0 %1614, %v2401_v45   ;;  %v2424_v35 = vpop.eup %1692 }
 0x5a5   :  { %v2427_v15 = vpop.eup %1694 }
 0x5a7   :  { %904 = vperm.xlu1 %1613, %v2398_v22  }
 0x5ab   :  { %907 = vperm.xlu1 %1613, %v2406_v25  }
 0x5af   :  { %910 = vperm.xlu1 %1613, %v2411_v27  }
 0x5b3   :  { %913 = vperm.xlu1 %1613, %v2415_v30  }
 0x5b7   :  { %916 = vperm.xlu1 %1613, %v2418_v34  }
 0x5bb   :  { %922 = vperm.xlu1 %1613, %v2421_v5  }
 0x5bf   :  { %928 = vperm.xlu1 %1613, %v2424_v35  }
 0x5c3   :  { %934 = vperm.xlu1 %1613, %v2427_v15  }
 0x616   :  { %v890_v41 = vpop.permute.xlu1 %889 }
 0x617   :  { %v893_v37 = vpop.permute.xlu0 %892  ;;  %v939_v4 = vrot.slane %v890_v41, %v2274_v47 }
 0x618   :  { %v943_v3 = vrot.slane %v893_v37, %v2277_v48 }
 0x61a   :  { %v896_v49 = vpop.permute.xlu1 %895  ;;  %v944_v20 = vsel %vm699_vm2, %v943_v3, %v939_v4 }
 0x61b   :  { %v920_v60 = vpop.permute.xlu0 %919  ;;  %v948_v6 = vrot.slane %v896_v49, %v2274_v47 }
 0x61c   :  { %v984_v21 = vrot.slane %v920_v60, %v2274_v47 }
 0x61e   :  { %v899_v53 = vpop.permute.xlu1 %898 }
 0x61f   :  { %v952_v39 = vrot.slane %v899_v53, %v2277_v48  ;;  %v926_v0 = vpop.permute.xlu0 %925 }
 0x620   :  { %v993_v44 = vrot.slane %v926_v0, %v2274_v47 }
 0x621   :  { %v953_v11 = vsel %vm699_vm2, %v952_v39, %v948_v6 }
 0x622   :  { %v902_v54 = vpop.permute.xlu1 %901  ;;  %v1008_v26 = vsel %vm764_vm3, %v953_v11, %v944_v20 }
 0x623   :  { %v957_v9 = vrot.slane %v902_v54, %v2274_v47  ;;  %v932_v29 = vpop.permute.xlu0 %931 }
 0x626   :  { %v905_v55 = vpop.permute.xlu1 %904 }
 0x627   :  { %v961_v1 = vrot.slane %v905_v55, %v2277_v48  ;;  %v1002_v55 = vrot.slane %v932_v29, %v2274_v47 }
 0x629   :  { %v962_v14 = vsel %vm699_vm2, %v961_v1, %v957_v9 }
 0x62a   :  { %v908_v56 = vpop.permute.xlu1 %907  ;;  %v1009_v32 = vsel %vm766_vm4, %v962_v14, %v1008_v26 }
 0x62b   :  { %v966_v12 = vrot.slane %v908_v56, %v2274_v47 }
 0x62e   :  { %v911_v40 = vpop.permute.xlu1 %910 }
 0x62f   :  { %v970_v31 = vrot.slane %v911_v40, %v2277_v48 }
 0x631   :  { %v971_v23 = vsel %vm699_vm2, %v970_v31, %v966_v12 }
 0x632   :  { %v914_v57 = vpop.permute.xlu1 %913  ;;  %v1010_v49 = vsel %vm768_vm5, %v971_v23, %v1009_v32  ;;  %v1618_v23 = vld [vmem:[#allocation15 + $0x14] ss:$8 sps:$4 sm:$0xff]  }
 0x633   :  { %v975_v17 = vrot.slane %v914_v57, %v2274_v47 }
 0x636   :  { %v917_v63 = vpop.permute.xlu1 %916 }
 0x637   :  { %v979_v10 = vrot.slane %v917_v63, %v2277_v48 }
 0x639   :  { %v980_v61 = vsel %vm699_vm2, %v979_v10, %v975_v17 }
 0x63a   :  { %v923_v2 = vpop.permute.xlu1 %922  ;;  %v1011_v56 = vsel %vm770_vm6, %v980_v61, %v1010_v49  ;;  %v367_v61 = vld [vmem:[#allocation8 + $0x18] sm:$0xff] }
 0x63b   :  { %v988_v13 = vrot.slane %v923_v2, %v2277_v48 }
 0x63d   :  { %v989_v41 = vsel %vm699_vm2, %v988_v13, %v984_v21 }
 0x63e   :  { %v929_v18 = vpop.permute.xlu1 %928  ;;  %v1012_v40 = vsel %vm772_vm7, %v989_v41, %v1011_v56  ;;  %v366_v41 = vld [vmem:[#allocation8 + $0x10] sm:$0xff] }
 0x63f   :  { %v997_v24 = vrot.slane %v929_v18, %v2277_v48 }
 0x641   :  { %v998_v53 = vsel %vm699_vm2, %v997_v24, %v993_v44 }
 0x642   :  { %v935_v54 = vpop.permute.xlu1 %934  ;;  %v1013_v60 = vsel %vm774_vm8, %v998_v53, %v1012_v40  ;;  %v368_v40 = vld [vmem:[#allocation8 + $0x20] sm:$0xff] }
 0x643   :  { %v1006_v37 = vrot.slane %v935_v54, %v2277_v48 }
 0x645   :  { %v1007_v57 = vsel %vm699_vm2, %v1006_v37, %v1002_v55  ;;  %v369_v55 = vld [vmem:[#allocation8 + $0x28] sm:$0xff] }
 0x646   :  { %v1014_v63 = vsel %vm776_vm9, %v1007_v57, %v1013_v60  ;;  %v371_v57 = vld [vmem:[#allocation8 + $0x38] sm:$0xff] }
 0x647   :  { %v1016_v39 = vsel %vm779_vm10, %v1014_v63, 0.0 }
 0x648   :  { %1017 = vadd.xlane.f32.xlu0 %v1016_v39 }
 0x6d5   :  { %v1018_v0 = vpop.xlane.xlu0 %1017 }
 0x6d6   :  { %v1039_v1 = vrot.slane %v1018_v0, %v802_v8  ;;  %v1023_v2 = vrot.slane %v1018_v0, %v2209_v59  ;;  %v1051_v3 = vrot.slane %v1018_v0, %v814_v38  ;;  %v1027_v4 = vrot.slane %v1018_v0, %v2338_v28 }
 0x6d7   :  { %v1031_v10 = vrot.slane %v1018_v0, %v794_v36  ;;  %v1035_v14 = vrot.slane %v1018_v0, %v798_v58 }
 0x6d8   :  { %1696 = vrcp.f32 %v1039_v1 }
 0x6d9   :  { %1698 = vrcp.f32 %v1023_v2  ;;  %v370_v2 = vld [vmem:[#allocation8 + $0x30] sm:$0xff] }
 0x6da   :  { %1700 = vrcp.f32 %v1051_v3  ;;  %v373_v3 = vld [vmem:[#allocation8 + $0x48] sm:$0xff] }
 0x6db   :  { %1702 = vrcp.f32 %v1027_v4  ;;  %v372_v4 = vld [vmem:[#allocation8 + $0x40] sm:$0xff] }
 0x6dc   :  { %1704 = vrcp.f32 %v1031_v10 }
 0x6dd   :  { %1706 = vrcp.f32 %v1035_v14 }
 0x6e2   :  { %v1697_v6 = vpop.eup %1696 }
 0x6e3   :  { %v1699_v31 = vpop.eup %1698  ;;  %v1073_v9 = vmul.f32 %v1697_v6, %v2415_v30 }
 0x6e4   :  { %v1701_v11 = vpop.eup %1700  ;;  %v1061_v8 = vmul.f32 %v1699_v31, %v2370_v62  ;;  %v1062_v12 = vmul.f32 %v1699_v31, %v2372_v7  ;;  %v1043_v7 = vrot.slane %v1018_v0, %v806_v33 }
 0x6e5   :  { %1125 = vperm.xlu0 %1614, %v1073_v9   ;;  %v1082_v38 = vmul.f32 %v1701_v11, %v2401_v45  ;;  %v1703_v13 = vpop.eup %1702 }
 0x6e6   :  { %1101 = vperm.xlu1 %1613, %v1061_v8   ;;  %v1064_v30 = vmul.f32 %v1703_v13, %v2378_v42  ;;  %v1065_v36 = vmul.f32 %v1703_v13, %v2384_v16  ;;  %v1705_v62 = vpop.eup %1704  ;;  %1708 = vrcp.f32 %v1043_v7  ;;  %v1047_v42 = vrot.slane %v1018_v0, %v810_v43 }
 0x6e7   :  { %v1067_v17 = vmul.f32 %v1705_v62, %v2391_v19  ;;  %v1068_v45 = vmul.f32 %v1705_v62, %v2398_v22  ;;  %v1707_v18 = vpop.eup %1706  ;;  %v1074_v19 = vmul.f32 %v1697_v6, %v2418_v34  ;;  %v1083_v43 = vmul.f32 %v1701_v11, %v2427_v15  ;;  %v1617_v34 = vld [vmem:[#allocation15] ss:$8 sps:$4 sm:$0xff]  }
 0x6e8   :  { %v1070_v58 = vmul.f32 %v1707_v18, %v2406_v25  ;;  %v1071_v16 = vmul.f32 %v1707_v18, %v2411_v27  ;;  %1710 = vrcp.f32 %v1047_v42  ;;  %v1615_v27 = vld [vmem:[#allocation15 + $0x4] ss:$8 sps:$4 sm:$0xff]  }
 0x6e9   :  { %1143 = vperm.xlu0 %1614, %v1082_v38   ;;  %1420 = vmatprep.subr.bf16.mxu1 %v1615_v27  ;;  %v364_v15 = vld [vmem:[#allocation8] sm:$0xff] }
 0x6ea   :  { %1104 = vperm.xlu1 %1613, %v1062_v12   ;;  %1421 = vmatpush1.bf16.msra.mxu1 %v1617_v34 }
 0x6eb   :  { %1422 = vmatprep.subr.bf16.mxu1 %v1618_v23 }
 0x6ee   :  { %1107 = vperm.xlu1 %1613, %v1064_v30   ;;  %v378_v30 = vld [vmem:[#allocation8 + $0x70] sm:$0xff] }
 0x6f0   :  { %v1709_v20 = vpop.eup %1708 }
 0x6f1   :  { %v1076_v33 = vmul.f32 %v1709_v20, %v2387_v52  ;;  %v1077_v22 = vmul.f32 %v1709_v20, %v2421_v5 }
 0x6f2   :  { %1110 = vperm.xlu1 %1613, %v1065_v36   ;;  %v1711_v21 = vpop.eup %1710 }
 0x6f3   :  { %v1079_v25 = vmul.f32 %v1711_v21, %v2394_v50  ;;  %v1080_v51 = vmul.f32 %v1711_v21, %v2424_v35  ;;  %v365_v35 = vld [vmem:[#allocation8 + $0x8] sm:$0xff]  ;;  %v375_v21 = vld [vmem:[#allocation8 + $0x58] sm:$0xff] }
 0x6f6   :  { %1113 = vperm.xlu1 %1613, %v1067_v17  }
 0x6fa   :  { %1116 = vperm.xlu1 %1613, %v1068_v45  }
 0x6fe   :  { %1119 = vperm.xlu1 %1613, %v1070_v58   ;;  %v374_v58 = vld [vmem:[#allocation8 + $0x50] sm:$0xff] }
 0x702   :  { %1122 = vperm.xlu1 %1613, %v1071_v16  }
 0x706   :  { %1128 = vperm.xlu1 %1613, %v1074_v19  }
 0x70a   :  { %1131 = vperm.xlu1 %1613, %v1076_v33  }
 0x70e   :  { %1134 = vperm.xlu1 %1613, %v1077_v22  }
 0x712   :  { %1137 = vperm.xlu1 %1613, %v1079_v25  }
 0x716   :  { %1140 = vperm.xlu1 %1613, %v1080_v51  }
 0x71a   :  { %1146 = vperm.xlu1 %1613, %v1083_v43  }
 0x764   :  { %v2514_v63 = vpop.permute.xlu0 %1125 }
 0x765   :  { %v2492_v52 = vpop.permute.xlu1 %1101  ;;  %v1253_v14 = vmul.f32 %v2514_v63, %v372_v4  ;;  %v1187_v43 = vrot.slane %v2514_v63, %v2274_v47 }
 0x766   :  { %v1245_v32 = vmul.f32 %v2492_v52, %v364_v15  ;;  %v1151_v27 = vrot.slane %v2492_v52, %v2274_v47 }
 0x767   :  { %v1297_v20 = vsel %vm172_vm1, %v1253_v14, 0.0 }
 0x768   :  { %v1261_v37 = vsel %vm172_vm1, %v1245_v32, 0.0  ;;  %v2527_v36 = vpop.permute.xlu0 %1143 }
 0x769   :  { %v2494_v5 = vpop.permute.xlu1 %1104  ;;  %v1259_v33 = vmul.f32 %v2527_v36, %v378_v30 }
 0x76a   :  { %v1246_v29 = vmul.f32 %v2494_v5, %v365_v35  ;;  %v1155_v15 = vrot.slane %v2494_v5, %v2277_v48 }
 0x76c   :  { %v1262_v54 = vsel %vm172_vm1, %v1246_v29, 0.0 }
 0x76d   :  { %v2496_v24 = vpop.permute.xlu1 %1107  ;;  %v1263_v39 = vadd.f32 %v1262_v54, %v1261_v37 }
 0x76e   :  { %v1247_v56 = vmul.f32 %v2496_v24, %v366_v41  ;;  %v1214_v41 = vrot.slane %v2527_v36, %v2274_v47 }
 0x76f   :  { %v1264_v8 = vrot.slane %v1263_v39, 4 }
 0x770   :  { %v1270_v6 = vsel %vm172_vm1, %v1247_v56, 0.0 }
 0x771   :  { %v2498_v50 = vpop.permute.xlu1 %1110  ;;  %v1265_v16 = vadd.f32 %v1264_v8, %v1263_v39  ;;  %v376_v39 = vld [vmem:[#allocation8 + $0x60] sm:$0xff] }
 0x772   :  { %v1248_v53 = vmul.f32 %v2498_v50, %v367_v61  ;;  %v1164_v61 = vrot.slane %v2498_v50, %v2277_v48 }
 0x773   :  { %v1266_v29 = vrot.slane %v1265_v16, 2 }
 0x774   :  { %v1271_v0 = vsel %vm172_vm1, %v1248_v53, 0.0  ;;  %v2546_v53 = vsel %vm172_vm1, %v1259_v33, 0.0 }
 0x775   :  { %v2500_v44 = vpop.permute.xlu1 %1113  ;;  %v1272_v10 = vadd.f32 %v1271_v0, %v1270_v6 }
 0x776   :  { %v1249_v31 = vmul.f32 %v2500_v44, %v368_v40  ;;  %v1169_v40 = vrot.slane %v2500_v44, %v2274_v47 }
 0x777   :  { %v1273_v7 = vrot.slane %v1272_v10, 4 }
 0x778   :  { %v1279_v62 = vsel %vm172_vm1, %v1249_v31, 0.0  ;;  %v377_v31 = vld [vmem:[#allocation8 + $0x68] sm:$0xff] }
 0x779   :  { %v2502_v26 = vpop.permute.xlu1 %1116  ;;  %v1274_v34 = vadd.f32 %v1273_v7, %v1272_v10 }
 0x77a   :  { %v1250_v1 = vmul.f32 %v2502_v26, %v369_v55  ;;  %v1173_v52 = vrot.slane %v2502_v26, %v2277_v48  ;;  %v1160_v55 = vrot.slane %v2496_v24, %v2274_v47  ;;  %v2557_v26 = vadd.f32 %v1266_v29, %v1265_v16 }
 0x77b   :  { %v1275_v50 = vrot.slane %v1274_v34, 2 }
 0x77c   :  { %v1280_v38 = vsel %vm172_vm1, %v1250_v1, 0.0  ;;  %v1156_v1 = vsel %vm699_vm2, %v1155_v15, %v1151_v27 }
 0x77d   :  { %v2506_v49 = vpop.permute.xlu1 %1119  ;;  %v1281_v45 = vadd.f32 %v1280_v38, %v1279_v62 }
 0x77e   :  { %v1251_v12 = vmul.f32 %v2506_v49, %v370_v2  ;;  %v1165_v2 = vsel %vm699_vm2, %v1164_v61, %v1160_v55 }
 0x77f   :  { %v1282_v23 = vrot.slane %v1281_v45, 4 }
 0x780   :  { %v1288_v19 = vsel %vm172_vm1, %v1251_v12, 0.0  ;;  %v1220_v12 = vsel %vm764_vm3, %v1165_v2, %v1156_v1 }
 0x781   :  { %v2512_v60 = vpop.permute.xlu1 %1122 }
 0x782   :  { %v1252_v9 = vmul.f32 %v2512_v60, %v371_v57  ;;  %v1283_v57 = vadd.f32 %v1282_v23, %v1281_v45  ;;  %v1182_v24 = vrot.slane %v2512_v60, %v2277_v48 }
 0x784   :  { %v1289_v17 = vsel %vm172_vm1, %v1252_v9, 0.0  ;;  %v1178_v9 = vrot.slane %v2506_v49, %v2274_v47  ;;  %v1284_v14 = vrot.slane %v1283_v57, 2 }
 0x785   :  { %v2521_v11 = vpop.permute.xlu1 %1128  ;;  %v1290_v22 = vadd.f32 %v1289_v17, %v1288_v19 }
 0x786   :  { %v1254_v13 = vmul.f32 %v2521_v11, %v373_v3  ;;  %v1174_v3 = vsel %vm699_vm2, %v1173_v52, %v1169_v40  ;;  %v1191_v6 = vrot.slane %v2521_v11, %v2277_v48  ;;  %v1183_v36 = vsel %vm699_vm2, %v1182_v24, %v1178_v9 }
 0x787   :  { %v1291_v54 = vrot.slane %v1290_v22, 4  ;;  %v1221_v7 = vsel %vm766_vm4, %v1174_v3, %v1220_v12  ;;  %v1285_v27 = vadd.f32 %v1284_v14, %v1283_v57 }
 0x788   :  { %v1298_v18 = vsel %vm172_vm1, %v1254_v13, 0.0  ;;  %v1276_v13 = vadd.f32 %v1275_v50, %v1274_v34  ;;  %v1192_v45 = vsel %vm699_vm2, %v1191_v6, %v1187_v43  ;;  %v1268_v50 = vrot.slane %v2557_v26, 1 }
 0x789   :  { %v1132_v42 = vpop.permute.xlu1 %1131  ;;  %v1299_v25 = vadd.f32 %v1298_v18, %v1297_v20  ;;  %v1292_v4 = vadd.f32 %v1291_v54, %v1290_v22 }
 0x78a   :  { %v1255_v51 = vmul.f32 %v1132_v42, %v374_v58  ;;  %v1196_v62 = vrot.slane %v1132_v42, %v2274_v47  ;;  %v379_v58 = vld [vmem:[#allocation8 + $0x78] sm:$0xff]  ;;  %v1222_v42 = vsel %vm768_vm5, %v1183_v36, %v1221_v7  ;;  %v1277_v23 = vrot.slane %v1276_v13, 1 }
 0x78b   :  { %v1300_v56 = vrot.slane %v1299_v25, 4  ;;  %v1293_v49 = vrot.slane %v1292_v4, 2  ;;  %v1223_v43 = vsel %vm770_vm6, %v1192_v45, %v1222_v42 }
 0x78c   :  { %v1306_v5 = vsel %vm172_vm1, %v1255_v51, 0.0  ;;  %v1278_v1 = vadd.f32 %v1277_v23, %v1276_v13  ;;  %v1623_v13 = vld [vmem:[#allocation15 + $0x34] ss:$8 sps:$4 sm:$0xff]  }
 0x78d   :  { %v1135_v35 = vpop.permute.xlu1 %1134  ;;  %v1301_v10 = vadd.f32 %v1300_v56, %v1299_v25 }
 0x78e   :  { %v1256_v32 = vmul.f32 %v1135_v35, %v375_v21  ;;  %v1200_v8 = vrot.slane %v1135_v35, %v2277_v48  ;;  %v1294_v35 = vadd.f32 %v1293_v49, %v1292_v4 }
 0x78f   :  { %v1302_v16 = vrot.slane %v1301_v10, 2 }
 0x790   :  { %v1307_v37 = vsel %vm172_vm1, %v1256_v32, 0.0  ;;  %v1201_v19 = vsel %vm699_vm2, %v1200_v8, %v1196_v62  ;;  %v1295_v40 = vrot.slane %v1294_v35, 1 }
 0x791   :  { %v1308_v63 = vadd.f32 %v1307_v37, %v1306_v5  ;;  %v1138_v0 = vpop.permute.xlu1 %1137  ;;  %v1224_v15 = vsel %vm772_vm7, %v1201_v19, %v1223_v43  ;;  %v1303_v61 = vadd.f32 %v1302_v16, %v1301_v10 }
 0x792   :  { %v1257_v38 = vmul.f32 %v1138_v0, %v376_v39  ;;  %v1205_v18 = vrot.slane %v1138_v0, %v2274_v47  ;;  %v1358_v39 = vld [vmem:[#allocation15 + $0x10] sm:$0xff] }
 0x793   :  { %v1309_v44 = vrot.slane %v1308_v63, 4  ;;  %v1304_v0 = vrot.slane %v1303_v61, 1 }
 0x794   :  { %v1315_v20 = vsel %vm172_vm1, %v1257_v38, 0.0  ;;  %v1622_v38 = vld [vmem:[#allocation15 + $0x20] ss:$8 sps:$4 sm:$0xff]  }
 0x795   :  { %v1310_v60 = vadd.f32 %v1309_v44, %v1308_v63  ;;  %v1141_v30 = vpop.permute.xlu1 %1140  ;;  %v1269_v44 = vadd.f32 %v1268_v50, %v2557_v26  ;;  %v1305_v8 = vadd.f32 %v1304_v0, %v1303_v61 }
 0x796   :  { %v1209_v11 = vrot.slane %v1141_v30, %v2277_v48  ;;  %v1258_v17 = vmul.f32 %v1141_v30, %v377_v31  ;;  %v1296_v31 = vadd.f32 %v1295_v40, %v1294_v35 }
 0x797   :  { %v1311_v22 = vrot.slane %v1310_v60, 2 }
 0x798   :  { %v1316_v33 = vsel %vm172_vm1, %v1258_v17, 0.0  ;;  %v1210_v21 = vsel %vm699_vm2, %v1209_v11, %v1205_v18  ;;  %v1625_v17 = vld [vmem:[#allocation15 + $0x30] ss:$8 sps:$4 sm:$0xff]  }
 0x799   :  { %v1317_v25 = vadd.f32 %v1316_v33, %v1315_v20  ;;  %v1147_v51 = vpop.permute.xlu1 %1146  ;;  %v1225_v54 = vsel %vm774_vm8, %v1210_v21, %v1224_v15  ;;  %v1312_v55 = vadd.f32 %v1311_v22, %v1310_v60  ;;  %v1341_v60 = vsel %vm764_vm3, %v1278_v1, %v1269_v44 }
 0x79a   :  { %v1218_v47 = vrot.slane %v1147_v51, %v2277_v48  ;;  %v1260_v34 = vmul.f32 %v1147_v51, %v379_v58  ;;  %v1286_v48 = vrot.slane %v1285_v27, 1 }
 0x79b   :  { %v1318_v29 = vrot.slane %v1317_v25, 4  ;;  %v1313_v2 = vrot.slane %v1312_v55, 1 }
 0x79c   :  { %v1219_v32 = vsel %vm699_vm2, %v1218_v47, %v1214_v41  ;;  %v1325_v52 = vsel %vm172_vm1, %v1260_v34, 0.0  ;;  %v1359_v41 = vld [vmem:[#allocation15 + $0x18] sm:$0xff]  ;;  %v1287_v4 = vadd.f32 %v1286_v48, %v1285_v27 }
 0x79d   :  { %v1319_v56 = vadd.f32 %v1318_v29, %v1317_v25  ;;  %v1326_v5 = vadd.f32 %v1325_v52, %v2546_v53  ;;  %v1226_v37 = vsel %vm776_vm9, %v1219_v32, %v1225_v54  ;;  %v1519_v6 = vcombine.low %v1358_v39, %v1359_v41  ;;  %v1620_v53 = vld [vmem:[#allocation15 + $0x24] ss:$8 sps:$4 sm:$0xff]  }
 0x79e   :  { %1228 = vst.msk [vmem:[#allocation20] sm:$0xff] %vm779_vm10, %v1226_v37  ;;  %v1314_v14 = vadd.f32 %v1313_v2, %v1312_v55  ;;  %v1342_v36 = vsel %vm766_vm4, %v1287_v4, %v1341_v60 }
 0x79f   :  { %v1320_v57 = vrot.slane %v1319_v56, 2  ;;  %v1327_v63 = vrot.slane %v1326_v5, 4  ;;  %1423 = vmatpush1.bf16.msra.mxu1 %v1519_v6  ;;  %v1343_v11 = vsel %vm768_vm5, %v1296_v31, %v1342_v36 }
 0x7a0   :  { %1424 = vmatprep.subr.bf16.mxu1 %v1620_v53  ;;  %v1344_v26 = vsel %vm770_vm6, %v1305_v8, %v1343_v11 }
 0x7a1   :  { %v1321_v24 = vadd.f32 %v1320_v57, %v1319_v56  ;;  %v1328_v3 = vadd.f32 %v1327_v63, %v1326_v5  ;;  %v1345_v49 = vsel %vm772_vm7, %v1314_v14, %v1344_v26 }
 0x7a3   :  { %v1329_v9 = vrot.slane %v1328_v3, 2  ;;  %v1322_v10 = vrot.slane %v1321_v24, 1  ;;  %1425 = vmatpush1.bf16.msra.mxu1 %v1622_v38 }
 0x7a4   :  { %1426 = vmatprep.subr.bf16.mxu1 %v1623_v13 }
 0x7a5   :  { %v1330_v12 = vadd.f32 %v1329_v9, %v1328_v3  ;;  %v1323_v30 = vadd.f32 %v1322_v10, %v1321_v24 }
 0x7a7   :  { %v1331_v62 = vrot.slane %v1330_v12, 1  ;;  %v1346_v45 = vsel %vm774_vm8, %v1323_v30, %v1345_v49  ;;  %1427 = vmatpush1.bf16.msra.mxu1 %v1625_v17 }
 0x7a9   :  { %v1332_v7 = vadd.f32 %v1331_v62, %v1330_v12 }
 0x7ab   :  { %v1347_v18 = vsel %vm776_vm9, %v1332_v7, %v1346_v45 }
 0x7ac   :  { %1348 = vrot.lane.b32.xlu0 %v1347_v18, %s1983_s7 }
 0x81e   :  { %v1349_v58 = vpop.permute.xlu0 %1348 }
 0x81f   :  { %v1351_v16 = vsel %vm172_vm1, %v2195_v46, %v1349_v58 }
 0x820   :  { %v1352_v19 = vpack.c.bf16 %v1351_v16, %v1351_v16 }
 0x822   :  { %1354 = vst.msk [vmem:[#allocation2] sm:$0xf] %vm1353_vm11, %v1352_v19 }
 0x829   :  { %v1355_v20 = vld [vmem:[#allocation2] sm:$0xf] }
 0x82a   :  { %1525 = vmatmul.mubr.msk.bf16.vlgmr.msra.gmra.mrb[0].mxu1 %vm1416_vm12, %v1355_v20 }
 0x82b   :  { %1899 = shalt.err (!%p1896_p12)
}
 0x82c   :  { %s1900_s16 = scalar_lea.hbm %s2656_s14, 128 }
 0x82d   :  { %p1901_p13 = scmp.ne.s32.totalorder %s2656_s14, %s1900_s16  ;;  %p1904_p0 = scmp.lt.u32.totalorder %s1900_s16, %s2656_s14 }
 0x82f   :  { %p1906_p1 = pnand %p1904_p0, %p1901_p13 }
 0x831   :  { %1909 = shalt.err (!%p1906_p1)
}
 0x832   :  { %1482 = dma.vmem_to_hbm [thread:$0]  %s1480_s25, 128, %s2656_s14, [#allocation19]  }
 0x833   :  { %s1987_s20 = smov [#allocation20]  }
 0x834   :  { %s1489_s21 = sshll.u32 %s1987_s20, 4  ;;  %s1490_s21 = int_to_ptr.vmem [resolvable:$true] %s1489_s21 }
 0x835   :  { %s1910_s8 = scalar_lea.vmem %s1490_s21, 128  ;;  %p1915_p3 = scmp.lt.s32.totalorder %s1490_s21, %s1490_s21 }
 0x836   :  { %p1911_p2 = scmp.ne.s32.totalorder %s1490_s21, %s1910_s8  ;;  %p1916_p4 = scmp.lt.s32.totalorder %s1910_s8, %s1910_s8 }
 0x838   :  { %p1917_p5 = por %p1916_p4, %p1915_p3 }
 0x83a   :  { %p1918_p6 = pnand %p1917_p5, %p1911_p2 }
 0x83c   :  { %1921 = shalt.err (!%p1918_p6)
}
 0x83d   :  { %s1922_s19 = scalar_lea.hbm %s2657_s15, 128 }
 0x83e   :  { %p1923_p7 = scmp.ne.s32.totalorder %s2657_s15, %s1922_s19  ;;  %p1926_p8 = scmp.lt.u32.totalorder %s1922_s19, %s2657_s15 }
 0x840   :  { %p1928_p9 = pnand %p1926_p8, %p1923_p7 }
 0x842   :  { %1931 = shalt.err (!%p1928_p9)
}
 0x843   :  { %1492 = dma.vmem_to_hbm [thread:$0]  %s1490_s21, 128, %s2657_s15, [#allocation19]   ;;  %v1364_v46 = vld [vmem:[%s2654_s12] sm:$0x3] }
 0x844   :  { %v1369_v33 = vrot.slane %v1364_v46, %v2209_v59  ;;  %v1373_v42 = vrot.slane %v1364_v46, %v2338_v28  ;;  %s1988_s9 = smov [#allocation17]  }
 0x845   :  { %s1469_s18 = sshll.u32 %s1988_s9, 4  ;;  %s1470_s18 = int_to_ptr.vmem [resolvable:$true] %s1469_s18 }
 0x846   :  { %s1932_s15 = scalar_lea.vmem %s1470_s18, 256  ;;  %p1937_p11 = scmp.lt.s32.totalorder %s1470_s18, %s1470_s18 }
 0x847   :  { %p1933_p10 = scmp.ne.s32.totalorder %s1470_s18, %s1932_s15  ;;  %p1938_p12 = scmp.lt.s32.totalorder %s1932_s15, %s1932_s15 }
 0x849   :  { %p1939_p13 = por %p1938_p12, %p1937_p11 }
 0x84b   :  { %p1940_p0 = pnand %p1939_p13, %p1933_p10 }
 0x8fd   :  { %v1454_v22 = vpop.f32.mrb[0].mxu1 }
 0x8fe   :  { %v1455_v21 = vadd.f32 %v1454_v22, %v1369_v33  ;;  %v1456_v25 = vpop.f32.mrb[1].mxu1 }
 0x8ff   :  { %v1457_v51 = vadd.f32 %v1456_v25, %v1373_v42  ;;  %v1458_v27 = vpop.f32.mrb[2].mxu1 }
 0x900   :  { %1461 = vst [vmem:[#allocation17] sm:$0xff] %v1455_v21  ;;  %v1459_v43 = vpop.f32.mrb[3].mxu1 }
 0x901   :  { %1462 = vst [vmem:[#allocation17 + $0x8] sm:$0xff] %v1457_v51 }
 0x902   :  { %1943 = shalt.err (!%p1940_p0)
}
 0x903   :  { %s1944_s25 = scalar_lea.hbm %s2655_s13, 256 }
 0x904   :  { %p1945_p1 = scmp.ne.s32.totalorder %s2655_s13, %s1944_s25  ;;  %p1948_p2 = scmp.lt.u32.totalorder %s1944_s25, %s2655_s13 }
 0x906   :  { %p1950_p3 = pnand %p1948_p2, %p1945_p1 }
 0x908   :  { %1953 = shalt.err (!%p1950_p3)
}
 0x909   :  { %1472 = dma.vmem_to_hbm [thread:$0]  %s1470_s18, 256, %s2655_s13, [#allocation5]  }
 0x90a   :  { %1964 = dma.done.wait [#allocation5], 256  }
 0x90b   :  { %1965 = vsyncadd [#allocation5], 4294967040 }
 0x90c   :  { %1966 = dma.done.wait [#allocation19], 256  }
 0x90d   :  { %1967 = vsyncadd [#allocation19], 4294967040 }
 0x90e   :  { %1502 = vsyncpa [#allocation4], 1 }
 0x90f   :  { %1503 = vsyncpa [#allocation7], 1 }
 0x910   :  { %1504 = vsyncpa [#allocation10], 1 }
 0x911   :  { %1505 = vsyncpa [#allocation13], 1 }
 0x912   :  { %1506 = vsyncpa [#allocation16], 1 }
 0x913   :  { %1507 = vsyncpa [#allocation5], 1 }
 0x914   :  { %1508 = vsyncpa [#allocation19], 1 }

</bundles_post_ra>
